<compile_context>
chip_gen: v5e
topology: v5e:2x2
jax: 0.10.0
libtpu: 0.0.40
codegen_flags: <defaults>
</compile_context>

<pallas_src>
import functools

import jax
import jax.numpy as jnp
import numpy as np
from jax import lax
from jax.experimental import pallas as pl
from jax.experimental.pallas import tpu as pltpu

EPS = 1e-5
_VMEM_LIMIT = 32 * 1024 * 1024            # <= scoped / physical VMEM on v5e / v6e / v7x


# --------------------------- 3x3 conv (+ optional fused input BN/ReLU) ----------------------
def _conv3x3_kernel(*refs, H, Wo, Cin, Cout, stride, pre_affine):
    # inputs : `stride` column-phase blocks (1, H, Wo, Cin); weight (9*Cin, Cout) bf16;
    #          optional (2, Cin) [scale; bias] of the *input's* BN (folded, applied pre-ReLU)
    # outputs: raw conv output (1, Ho, Wo, Cout) f32; BN stat partials (1, 8, Cout)
    #          (row 0 = per-channel sum, row 1 = per-channel sum-of-squares of this block)
    o_ref, st_ref = refs[-2], refs[-1]
    x_refs = refs[:stride]
    w_ref = refs[stride]
    Ho = H // stride

    if pre_affine:
        sb = refs[stride + 1][...]                       # (2, Cin) f32
        scale = sb[0:1].reshape(1, 1, Cin)
        bias = sb[1:2].reshape(1, 1, Cin)

    phases = []
    for r in x_refs:
        x = r[0]                                         # (H, Wo, Cin)
        if pre_affine:                                   # fused bn1-normalize + ReLU (f32)
            x = jnp.maximum(x.astype(jnp.float32) * scale + bias, 0.0)
        phases.append(x.astype(jnp.bfloat16))            # bf16 operands for the MXU

    zrow = jnp.zeros((1, Wo, Cin), jnp.bfloat16)
    zcol = jnp.zeros((Ho, 1, Cin), jnp.bfloat16)

    def tap(dy, dx):
        # tap(dy, dx)[i, j, c] == x_padded[stride*i + dy, stride*j + dx, c]
        a, qr = (dy - 1) % stride, (dy - 1) // stride
        b, qc = (dx - 1) % stride, (dx - 1) // stride
        t = phases[b]                                    # all rows, columns == b (mod stride)
        t = t.reshape(Ho, stride, Wo, Cin)[:, a]         # rows a, a+stride, ... -> (Ho, Wo, Cin)
        if qr == -1:                                     # halo (pad=1) built in-kernel
            t = jnp.concatenate([zrow, t[:Ho - 1]], axis=0)
        elif qr == 1:
            t = jnp.concatenate([t[1:], zrow], axis=0)
        if qc == -1:
            t = jnp.concatenate([zcol, t[:, :Wo - 1]], axis=1)
        elif qc == 1:
            t = jnp.concatenate([t[:, 1:], zcol], axis=1)
        return t

    # full im2col: one fat K = 9*Cin MXU matmul instead of 9 thin K = Cin dots
    patch = jnp.concatenate([tap(dy, dx) for dy in range(3) for dx in range(3)],
                            axis=-1).reshape(Ho * Wo, 9 * Cin)
    acc = jnp.dot(patch, w_ref[...], preferred_element_type=jnp.float32)   # (Ho*Wo, Cout) f32

    o_ref[0] = acc.reshape(Ho, Wo, Cout)
    # BN batch-stat partials in the conv epilogue (saves one HBM re-read of the output)
    s = jnp.sum(acc, axis=0, keepdims=True)
    ss = jnp.sum(acc * acc, axis=0, keepdims=True)
    st_ref[0] = jnp.concatenate([s, ss, jnp.zeros((6, Cout), jnp.float32)], axis=0)


def _conv3x3(x_phases, w_flat, sb, *, H, Wo, Cin, Cout, stride):
    # TODO(synk): add an H-tile grid axis (with halo handling) for very large spatial extents.
    N = x_phases[0].shape[0]
    Ho = H // stride
    pre_affine = sb is not None
    kernel = functools.partial(_conv3x3_kernel, H=H, Wo=Wo, Cin=Cin, Cout=Cout,
                               stride=stride, pre_affine=pre_affine)
    in_specs = [pl.BlockSpec((1, H, Wo, Cin), lambda n: (n, 0, 0, 0)) for _ in range(stride)]
    in_specs.append(pl.BlockSpec((9 * Cin, Cout), lambda n: (0, 0)))
    args = list(x_phases) + [w_flat]
    if pre_affine:
        in_specs.append(pl.BlockSpec((2, Cin), lambda n: (0, 0)))
        args.append(sb)
    return pl.pallas_call(
        kernel,
        out_shape=(jax.ShapeDtypeStruct((N, Ho, Wo, Cout), jnp.float32),
                   jax.ShapeDtypeStruct((N, 8, Cout), jnp.float32)),
        grid=(N,),
        in_specs=in_specs,
        out_specs=(pl.BlockSpec((1, Ho, Wo, Cout), lambda n: (n, 0, 0, 0)),
                   pl.BlockSpec((1, 8, Cout), lambda n: (n, 0, 0))),
        compiler_params=pltpu.CompilerParams(dimension_semantics=("parallel",),
                                             vmem_limit_bytes=_VMEM_LIMIT),
    )(*args)


# --------------------------- 1x1 conv (projection shortcut), direct strided -----------------
def _conv1x1_kernel(x_ref, w_ref, o_ref, st_ref, *, H, Wo, Cin, Cout, stride):
    Ho = H // stride
    x = x_ref[0]                                          # (H, Wo, Cin): columns 0, s, 2s, ...
    x = x.reshape(Ho, stride, Wo, Cin)[:, 0]              # rows 0, s, 2s, ...
    a = x.reshape(Ho * Wo, Cin).astype(jnp.bfloat16)
    acc = jnp.dot(a, w_ref[...], preferred_element_type=jnp.float32)
    o_ref[0] = acc.reshape(Ho, Wo, Cout)
    s = jnp.sum(acc, axis=0, keepdims=True)
    ss = jnp.sum(acc * acc, axis=0, keepdims=True)
    st_ref[0] = jnp.concatenate([s, ss, jnp.zeros((6, Cout), jnp.float32)], axis=0)


def _conv1x1(x0, w, *, H, Wo, Cin, Cout, stride):
    N = x0.shape[0]
    Ho = H // stride
    kernel = functools.partial(_conv1x1_kernel, H=H, Wo=Wo, Cin=Cin, Cout=Cout, stride=stride)
    return pl.pallas_call(
        kernel,
        out_shape=(jax.ShapeDtypeStruct((N, Ho, Wo, Cout), jnp.float32),
                   jax.ShapeDtypeStruct((N, 8, Cout), jnp.float32)),
        grid=(N,),
        in_specs=[pl.BlockSpec((1, H, Wo, Cin), lambda n: (n, 0, 0, 0)),
                  pl.BlockSpec((Cin, Cout), lambda n: (0, 0))],
        out_specs=(pl.BlockSpec((1, Ho, Wo, Cout), lambda n: (n, 0, 0, 0)),
                   pl.BlockSpec((1, 8, Cout), lambda n: (n, 0, 0))),
        compiler_params=pltpu.CompilerParams(dimension_semantics=("parallel",),
                                             vmem_limit_bytes=_VMEM_LIMIT),
    )(x0, w)


# --------------------------- fused bn2-normalize + residual-BN + add + ReLU -----------------
def _bn_add_relu_kernel(c2_ref, sc_ref, p_ref, o_ref):
    C = p_ref.shape[1]
    p = p_ref[...]
    s2 = p[0:1].reshape(1, 1, C)
    b2 = p[1:2].reshape(1, 1, C)
    ssc = p[2:3].reshape(1, 1, C)
    bsc = p[3:4].reshape(1, 1, C)
    y = c2_ref[0] * s2 + b2 + sc_ref[0].astype(jnp.float32) * ssc + bsc
    o_ref[0] = jnp.maximum(y, 0.0)


def _bn_add_relu(c2, sc, prm):
    N, Ho, Wo, Cout = c2.shape
    TH = 8 if Ho % 8 == 0 else Ho                          # spatial tiling of the streaming pass
    grid = (N, Ho // TH)
    blk = pl.BlockSpec((1, TH, Wo, Cout), lambda n, h: (n, h, 0, 0))
    return pl.pallas_call(
        _bn_add_relu_kernel,
        out_shape=jax.ShapeDtypeStruct((N, Ho, Wo, Cout), jnp.float32),
        grid=grid,
        in_specs=[blk, blk, pl.BlockSpec((4, Cout), lambda n, h: (0, 0))],
        out_specs=blk,
        compiler_params=pltpu.CompilerParams(dimension_semantics=("parallel", "parallel"),
                                             vmem_limit_bytes=_VMEM_LIMIT),
    )(c2, sc, prm)


# --------------------------- BN batch statistics -> folded scale / bias ---------------------
def _bn_scale_bias(stats, count, gamma, beta):
    # stats: (N, 8, C) partials emitted by the conv epilogues (rows 0/1 = sum / sum-of-squares)
    s = jnp.sum(stats[:, 0, :], axis=0)
    ss = jnp.sum(stats[:, 1, :], axis=0)
    mean = s / count
    var = ss / count - mean * mean                         # biased variance (PyTorch training)
    scale = gamma * lax.rsqrt(var + EPS)
    return scale, beta - mean * scale


# --------------------------- BasicBlock forward ---------------------------------------------
def basic_block_forward(x_nchw, params, stride):
    N, Cin, H, W = x_nchw.shape
    assert H % stride == 0 and W % stride == 0, "spatial dims must be divisible by stride"
    w1 = params["w1"]                                      # (3, 3, Cin, Cmid)  HWIO
    w2 = params["w2"]                                      # (3, 3, Cmid, Cout) HWIO
    Cmid, Cout = w1.shape[3], w2.shape[3]
    Ho, Wo = H // stride, W // stride

    x = jnp.transpose(x_nchw, (0, 2, 3, 1)).astype(jnp.float32)     # NCHW -> NHWC
    x_bf = x.astype(jnp.bfloat16)                          # bf16 MXU operands, f32 accumulate
    # column-phase split enables a *direct* strided conv1 (replaces the old wrapper-side
    # jnp.pad; all phases together are a single read/write of x). stride==1 -> untouched.
    x_phases = tuple(x_bf[:, :, b::stride, :] for b in range(stride)) if stride > 1 else (x_bf,)

    w1f = w1.reshape(9 * Cin, Cmid).astype(jnp.bfloat16)
    w2f = w2.reshape(9 * Cmid, Cout).astype(jnp.bfloat16)

    # conv1 (direct strided im2col) + bn1 batch-stat partials in the epilogue
    c1, st1 = _conv3x3(x_phases, w1f, None, H=H, Wo=Wo, Cin=Cin, Cout=Cmid, stride=stride)
    s1, b1 = _bn_scale_bias(st1, N * Ho * Wo, params["g1"], params["b1"])

    # conv2 with bn1-normalize + ReLU fused into its input read; bn2 stats in the epilogue
    c2, st2 = _conv3x3((c1,), w2f, jnp.stack([s1, b1], axis=0),
                       H=Ho, Wo=Wo, Cin=Cmid, Cout=Cout, stride=1)
    s2, b2 = _bn_scale_bias(st2, N * Ho * Wo, params["g2"], params["b2"])

    if "w_sc" in params:                                   # projection shortcut: 1x1 conv + BN
        wsc = params["w_sc"].astype(jnp.bfloat16)          # (Cin, Cout)
        sc, stsc = _conv1x1(x_phases[0], wsc, H=H, Wo=Wo, Cin=Cin, Cout=Cout, stride=stride)
        ssc, bsc = _bn_scale_bias(stsc, N * Ho * Wo, params["g_sc"], params["b_sc"])
    else:                                                  # identity shortcut
        sc = x
        ssc = jnp.ones((Cout,), jnp.float32)
        bsc = jnp.zeros((Cout,), jnp.float32)

    prm = jnp.stack([s2, b2, ssc, bsc], axis=0)            # (4, Cout)
    out = _bn_add_relu(c2, sc, prm)                        # fused bn2 + residual + ReLU
    return jnp.transpose(out, (0, 3, 1, 2))                # NHWC -> NCHW
    # TODO(synk): BatchNorm running-stat buffer updates (training-side state) are not
    # materialized; only the forward output is reproduced.


# --------------------------- pure-JAX f32 reference (PyTorch semantics) ---------------------
def _ref_conv(x, w_oihw, s, pad):
    return lax.conv_general_dilated(
        x, w_oihw, window_strides=(s, s), padding=((pad, pad), (pad, pad)),
        dimension_numbers=("NCHW", "OIHW", "NCHW"), precision=lax.Precision.HIGHEST)


def _ref_bn(x, g, b):
    mean = jnp.mean(x, axis=(0, 2, 3), keepdims=True)
    var = jnp.mean((x - mean) ** 2, axis=(0, 2, 3), keepdims=True)
    return (x - mean) * lax.rsqrt(var + EPS) * g.reshape(1, -1, 1, 1) + b.reshape(1, -1, 1, 1)


def ref_forward(x, raw, stride):
    o = jax.nn.relu(_ref_bn(_ref_conv(x, raw["w1"], stride, 1), raw["g1"], raw["b1"]))
    o = _ref_bn(_ref_conv(o, raw["w2"], 1, 1), raw["g2"], raw["b2"])
    if "w_sc" in raw:
        sc = _ref_bn(_ref_conv(x, raw["w_sc"], stride, 0), raw["g_sc"], raw["b_sc"])
    else:
        sc = x
    return jax.nn.relu(o + sc)


# --------------------------- demo / self-test ------------------------------------------------
if __name__ == "__main__":
    def make_case(key, N, Cin, H, W, planes, stride):
        ks = jax.random.split(key, 8)
        x = jax.random.normal(ks[0], (N, Cin, H, W), jnp.float32)
        w1 = 0.1 * jax.random.normal(ks[1], (planes, Cin, 3, 3), jnp.float32)
        w2 = 0.1 * jax.random.normal(ks[2], (planes, planes, 3, 3), jnp.float32)

        def bn_par(k):
            kg, kb = jax.random.split(k)
            return (1.0 + 0.1 * jax.random.normal(kg, (planes,), jnp.float32),
                    0.1 * jax.random.normal(kb, (planes,), jnp.float32))

        g1, b1 = bn_par(ks[3])
        g2, b2 = bn_par(ks[4])
        raw = dict(w1=w1, w2=w2, g1=g1, b1=b1, g2=g2, b2=b2)
        params = dict(w1=jnp.transpose(w1, (2, 3, 1, 0)),      # OIHW -> HWIO
                      w2=jnp.transpose(w2, (2, 3, 1, 0)),
                      g1=g1, b1=b1, g2=g2, b2=b2)
        if stride != 1 or Cin != planes:
            wsc = 0.1 * jax.random.normal(ks[5], (planes, Cin, 1, 1), jnp.float32)
            gsc, bsc = bn_par(ks[6])
            raw.update(w_sc=wsc, g_sc=gsc, b_sc=bsc)
            params.update(w_sc=jnp.transpose(wsc[:, :, 0, 0], (1, 0)),   # (Cin, Cout)
                          g_sc=gsc, b_sc=bsc)
        return x, raw, params

    key = jax.random.PRNGKey(0)
    k1, k2 = jax.random.split(key)
    cases = [
        ("projection / stride 2", *make_case(k1, 2, 4, 16, 16, 8, 2), 2),
        ("identity / stride 1",   *make_case(k2, 2, 8, 16, 16, 8, 1), 1),
    ]

    fwd = jax.jit(basic_block_forward, static_argnums=2)
    for name, x, raw, params, stride in cases:
        out = jax.block_until_ready(fwd(x, params, stride))
        ref = ref_forward(x, raw, stride)
        # tolerances sized for bf16 MXU operands (f32 accumulation, f32 BN statistics)
        np.testing.assert_allclose(np.asarray(out), np.asarray(ref), rtol=5e-2, atol=8e-2)

    print("KERNEL_OK")
</pallas_src>

<mosaic_0001>
module attributes {stable_mosaic.version = 11 : i64} {
  func.func @_conv3x3_kernel(%arg0: i32, %arg1: memref<1x16x8x4xbf16, #tpu.memory_space<vmem>>, %arg2: memref<1x16x8x4xbf16, #tpu.memory_space<vmem>>, %arg3: memref<36x8xbf16, #tpu.memory_space<vmem>>, %arg4: memref<1x8x8x8xf32, #tpu.memory_space<vmem>>, %arg5: memref<1x8x8xf32, #tpu.memory_space<vmem>>) attributes {dimension_semantics = [#tpu.dimension_semantics<parallel>], iteration_bounds = array<i64: 2>, scalar_prefetch = 0 : i64, scratch_operands = 0 : i64, tpu.core_type = #tpu.core_type<tc>, window_params = [{transform_indices = @transform_0, window_bounds = array<i64: 1, 16, 8, 4>}, {transform_indices = @transform_1, window_bounds = array<i64: 1, 16, 8, 4>}, {pipeline_mode = #tpu.pipeline_mode<synchronous>, transform_indices = @transform_2, window_bounds = array<i64: 36, 8>}, {transform_indices = @transform_3, window_bounds = array<i64: 1, 8, 8, 8>}, {transform_indices = @transform_4, window_bounds = array<i64: 1, 8, 8>}]} {
    %c0 = arith.constant 0 : index
    %c0_0 = arith.constant 0 : index
    %c0_1 = arith.constant 0 : index
    %c0_2 = arith.constant 0 : index
    %0 = vector.load %arg1[%c0, %c0_0, %c0_1, %c0_2] : memref<1x16x8x4xbf16, #tpu.memory_space<vmem>>, vector<1x16x8x4xbf16>
    %1 = vector.shape_cast %0 : vector<1x16x8x4xbf16> to vector<16x8x4xbf16>
    %c0_3 = arith.constant 0 : index
    %c0_4 = arith.constant 0 : index
    %c0_5 = arith.constant 0 : index
    %c0_6 = arith.constant 0 : index
    %2 = vector.load %arg2[%c0_3, %c0_4, %c0_5, %c0_6] : memref<1x16x8x4xbf16, #tpu.memory_space<vmem>>, vector<1x16x8x4xbf16>
    %3 = vector.shape_cast %2 : vector<1x16x8x4xbf16> to vector<16x8x4xbf16>
    %cst = arith.constant 0.000000e+00 : bf16
    %4 = vector.broadcast %cst : bf16 to vector<1x8x4xbf16>
    %cst_7 = arith.constant 0.000000e+00 : bf16
    %5 = vector.broadcast %cst_7 : bf16 to vector<8x1x4xbf16>
    %6 = vector.shape_cast %3 : vector<16x8x4xbf16> to vector<8x2x8x4xbf16>
    %7 = vector.extract_strided_slice %6 {offsets = [0, 1, 0, 0], sizes = [8, 1, 8, 4], strides = [1, 1, 1, 1]} : vector<8x2x8x4xbf16> to vector<8x1x8x4xbf16>
    %8 = vector.shape_cast %7 : vector<8x1x8x4xbf16> to vector<8x8x4xbf16>
    %9 = vector.extract_strided_slice %8 {offsets = [0, 0, 0], sizes = [7, 8, 4], strides = [1, 1, 1]} : vector<8x8x4xbf16> to vector<7x8x4xbf16>
    %10 = tpu.concatenate %4, %9 in 0 : vector<1x8x4xbf16>, vector<7x8x4xbf16> -> vector<8x8x4xbf16>
    %11 = vector.extract_strided_slice %10 {offsets = [0, 0, 0], sizes = [8, 7, 4], strides = [1, 1, 1]} : vector<8x8x4xbf16> to vector<8x7x4xbf16>
    %12 = tpu.concatenate %5, %11 in 1 : vector<8x1x4xbf16>, vector<8x7x4xbf16> -> vector<8x8x4xbf16>
    %13 = vector.shape_cast %1 : vector<16x8x4xbf16> to vector<8x2x8x4xbf16>
    %14 = vector.extract_strided_slice %13 {offsets = [0, 1, 0, 0], sizes = [8, 1, 8, 4], strides = [1, 1, 1, 1]} : vector<8x2x8x4xbf16> to vector<8x1x8x4xbf16>
    %15 = vector.shape_cast %14 : vector<8x1x8x4xbf16> to vector<8x8x4xbf16>
    %16 = vector.extract_strided_slice %15 {offsets = [0, 0, 0], sizes = [7, 8, 4], strides = [1, 1, 1]} : vector<8x8x4xbf16> to vector<7x8x4xbf16>
    %17 = tpu.concatenate %4, %16 in 0 : vector<1x8x4xbf16>, vector<7x8x4xbf16> -> vector<8x8x4xbf16>
    %18 = vector.shape_cast %3 : vector<16x8x4xbf16> to vector<8x2x8x4xbf16>
    %19 = vector.extract_strided_slice %18 {offsets = [0, 1, 0, 0], sizes = [8, 1, 8, 4], strides = [1, 1, 1, 1]} : vector<8x2x8x4xbf16> to vector<8x1x8x4xbf16>
    %20 = vector.shape_cast %19 : vector<8x1x8x4xbf16> to vector<8x8x4xbf16>
    %21 = vector.extract_strided_slice %20 {offsets = [0, 0, 0], sizes = [7, 8, 4], strides = [1, 1, 1]} : vector<8x8x4xbf16> to vector<7x8x4xbf16>
    %22 = tpu.concatenate %4, %21 in 0 : vector<1x8x4xbf16>, vector<7x8x4xbf16> -> vector<8x8x4xbf16>
    %23 = vector.shape_cast %3 : vector<16x8x4xbf16> to vector<8x2x8x4xbf16>
    %24 = vector.extract_strided_slice %23 {offsets = [0, 0, 0, 0], sizes = [8, 1, 8, 4], strides = [1, 1, 1, 1]} : vector<8x2x8x4xbf16> to vector<8x1x8x4xbf16>
    %25 = vector.shape_cast %24 : vector<8x1x8x4xbf16> to vector<8x8x4xbf16>
    %26 = vector.extract_strided_slice %25 {offsets = [0, 0, 0], sizes = [8, 7, 4], strides = [1, 1, 1]} : vector<8x8x4xbf16> to vector<8x7x4xbf16>
    %27 = tpu.concatenate %5, %26 in 1 : vector<8x1x4xbf16>, vector<8x7x4xbf16> -> vector<8x8x4xbf16>
    %28 = vector.shape_cast %1 : vector<16x8x4xbf16> to vector<8x2x8x4xbf16>
    %29 = vector.extract_strided_slice %28 {offsets = [0, 0, 0, 0], sizes = [8, 1, 8, 4], strides = [1, 1, 1, 1]} : vector<8x2x8x4xbf16> to vector<8x1x8x4xbf16>
    %30 = vector.shape_cast %29 : vector<8x1x8x4xbf16> to vector<8x8x4xbf16>
    %31 = vector.shape_cast %3 : vector<16x8x4xbf16> to vector<8x2x8x4xbf16>
    %32 = vector.extract_strided_slice %31 {offsets = [0, 0, 0, 0], sizes = [8, 1, 8, 4], strides = [1, 1, 1, 1]} : vector<8x2x8x4xbf16> to vector<8x1x8x4xbf16>
    %33 = vector.shape_cast %32 : vector<8x1x8x4xbf16> to vector<8x8x4xbf16>
    %34 = vector.shape_cast %3 : vector<16x8x4xbf16> to vector<8x2x8x4xbf16>
    %35 = vector.extract_strided_slice %34 {offsets = [0, 1, 0, 0], sizes = [8, 1, 8, 4], strides = [1, 1, 1, 1]} : vector<8x2x8x4xbf16> to vector<8x1x8x4xbf16>
    %36 = vector.shape_cast %35 : vector<8x1x8x4xbf16> to vector<8x8x4xbf16>
    %37 = vector.extract_strided_slice %36 {offsets = [0, 0, 0], sizes = [8, 7, 4], strides = [1, 1, 1]} : vector<8x8x4xbf16> to vector<8x7x4xbf16>
    %38 = tpu.concatenate %5, %37 in 1 : vector<8x1x4xbf16>, vector<8x7x4xbf16> -> vector<8x8x4xbf16>
    %39 = vector.shape_cast %1 : vector<16x8x4xbf16> to vector<8x2x8x4xbf16>
    %40 = vector.extract_strided_slice %39 {offsets = [0, 1, 0, 0], sizes = [8, 1, 8, 4], strides = [1, 1, 1, 1]} : vector<8x2x8x4xbf16> to vector<8x1x8x4xbf16>
    %41 = vector.shape_cast %40 : vector<8x1x8x4xbf16> to vector<8x8x4xbf16>
    %42 = vector.shape_cast %3 : vector<16x8x4xbf16> to vector<8x2x8x4xbf16>
    %43 = vector.extract_strided_slice %42 {offsets = [0, 1, 0, 0], sizes = [8, 1, 8, 4], strides = [1, 1, 1, 1]} : vector<8x2x8x4xbf16> to vector<8x1x8x4xbf16>
    %44 = vector.shape_cast %43 : vector<8x1x8x4xbf16> to vector<8x8x4xbf16>
    %45 = tpu.concatenate %12, %17, %22, %27, %30, %33, %38, %41, %44 in 2 : vector<8x8x4xbf16>, vector<8x8x4xbf16>, vector<8x8x4xbf16>, vector<8x8x4xbf16>, vector<8x8x4xbf16>, vector<8x8x4xbf16>, vector<8x8x4xbf16>, vector<8x8x4xbf16>, vector<8x8x4xbf16> -> vector<8x8x36xbf16>
    %46 = vector.shape_cast %45 : vector<8x8x36xbf16> to vector<64x36xbf16>
    %c0_8 = arith.constant 0 : index
    %c0_9 = arith.constant 0 : index
    %47 = vector.load %arg3[%c0_8, %c0_9] : memref<36x8xbf16, #tpu.memory_space<vmem>>, vector<36x8xbf16>
    %cst_10 = arith.constant dense<0.000000e+00> : vector<64x8xf32>
    %48 = tpu.matmul %46, %47, %cst_10 {dimension_numbers = #tpu.dot_dimension_numbers<[1], [0], [0], [1], [0, 0, 1, 1], [], []>} : vector<64x36xbf16>, vector<36x8xbf16>, vector<64x8xf32> -> vector<64x8xf32>
    %49 = vector.shape_cast %48 : vector<64x8xf32> to vector<8x8x8xf32>
    %c0_11 = arith.constant 0 : index
    %c0_12 = arith.constant 0 : index
    %c0_13 = arith.constant 0 : index
    %c0_14 = arith.constant 0 : index
    %50 = vector.load %arg4[%c0_11, %c0_12, %c0_13, %c0_14] : memref<1x8x8x8xf32, #tpu.memory_space<vmem>>, vector<1x8x8x8xf32>
    %51 = vector.shape_cast %50 : vector<1x8x8x8xf32> to vector<8x8x8xf32>
    %52 = vector.shape_cast %49 : vector<8x8x8xf32> to vector<1x8x8x8xf32>
    tpu.vector_store %arg4[%c0_11, %c0_12, %c0_13, %c0_14], %52 {strides = array<i32>} : memref<1x8x8x8xf32, #tpu.memory_space<vmem>>, vector<1x8x8x8xf32>,
    %cst_15 = arith.constant dense<0.000000e+00> : vector<8xf32>
    %53 = vector.multi_reduction <add>, %48, %cst_15 [0] : vector<64x8xf32> to vector<8xf32>
    %54 = vector.shape_cast %53 : vector<8xf32> to vector<1x8xf32>
    %55 = arith.mulf %48, %48 : vector<64x8xf32>
    %cst_16 = arith.constant dense<0.000000e+00> : vector<8xf32>
    %56 = vector.multi_reduction <add>, %55, %cst_16 [0] : vector<64x8xf32> to vector<8xf32>
    %57 = vector.shape_cast %56 : vector<8xf32> to vector<1x8xf32>
    %cst_17 = arith.constant 0.000000e+00 : f32
    %58 = vector.broadcast %cst_17 : f32 to vector<6x8xf32>
    %59 = tpu.concatenate %54, %57, %58 in 0 : vector<1x8xf32>, vector<1x8xf32>, vector<6x8xf32> -> vector<8x8xf32>
    %c0_18 = arith.constant 0 : index
    %c0_19 = arith.constant 0 : index
    %c0_20 = arith.constant 0 : index
    %60 = vector.load %arg5[%c0_18, %c0_19, %c0_20] : memref<1x8x8xf32, #tpu.memory_space<vmem>>, vector<1x8x8xf32>
    %61 = vector.shape_cast %60 : vector<1x8x8xf32> to vector<8x8xf32>
    %62 = vector.shape_cast %59 : vector<8x8xf32> to vector<1x8x8xf32>
    tpu.vector_store %arg5[%c0_18, %c0_19, %c0_20], %62 {strides = array<i32>} : memref<1x8x8xf32, #tpu.memory_space<vmem>>, vector<1x8x8xf32>,
    return
  }
  func.func @transform_0(%arg0: i32) -> (i32, i32, i32, i32) {
    %c0_i32 = arith.constant 0 : i32
    %c0_i32_0 = arith.constant 0 : i32
    %c0_i32_1 = arith.constant 0 : i32
    %c0_i32_2 = arith.constant 0 : i32
    return %arg0, %c0_i32, %c0_i32_0, %c0_i32_1 : i32, i32, i32, i32
  }
  func.func @transform_1(%arg0: i32) -> (i32, i32, i32, i32) {
    %c0_i32 = arith.constant 0 : i32
    %c0_i32_0 = arith.constant 0 : i32
    %c0_i32_1 = arith.constant 0 : i32
    %c0_i32_2 = arith.constant 0 : i32
    return %arg0, %c0_i32, %c0_i32_0, %c0_i32_1 : i32, i32, i32, i32
  }
  func.func @transform_2(%arg0: i32) -> (i32, i32) {
    %c0_i32 = arith.constant 0 : i32
    %c0_i32_0 = arith.constant 0 : i32
    %c0_i32_1 = arith.constant 0 : i32
    return %c0_i32, %c0_i32_0 : i32, i32
  }
  func.func @transform_3(%arg0: i32) -> (i32, i32, i32, i32) {
    %c0_i32 = arith.constant 0 : i32
    %c0_i32_0 = arith.constant 0 : i32
    %c0_i32_1 = arith.constant 0 : i32
    %c0_i32_2 = arith.constant 0 : i32
    return %arg0, %c0_i32, %c0_i32_0, %c0_i32_1 : i32, i32, i32, i32
  }
  func.func @transform_4(%arg0: i32) -> (i32, i32, i32) {
    %c0_i32 = arith.constant 0 : i32
    %c0_i32_0 = arith.constant 0 : i32
    %c0_i32_1 = arith.constant 0 : i32
    return %arg0, %c0_i32, %c0_i32_0 : i32, i32, i32
  }
}

module attributes {stable_mosaic.version = 11 : i64} {
  func.func @_conv3x3_kernel(%arg0: i32, %arg1: memref<1x8x8x8xf32, #tpu.memory_space<vmem>>, %arg2: memref<72x8xbf16, #tpu.memory_space<vmem>>, %arg3: memref<2x8xf32, #tpu.memory_space<vmem>>, %arg4: memref<1x8x8x8xf32, #tpu.memory_space<vmem>>, %arg5: memref<1x8x8xf32, #tpu.memory_space<vmem>>) attributes {dimension_semantics = [#tpu.dimension_semantics<parallel>], iteration_bounds = array<i64: 2>, scalar_prefetch = 0 : i64, scratch_operands = 0 : i64, tpu.core_type = #tpu.core_type<tc>, window_params = [{transform_indices = @transform_0, window_bounds = array<i64: 1, 8, 8, 8>}, {pipeline_mode = #tpu.pipeline_mode<synchronous>, transform_indices = @transform_1, window_bounds = array<i64: 72, 8>}, {pipeline_mode = #tpu.pipeline_mode<synchronous>, transform_indices = @transform_2, window_bounds = array<i64: 2, 8>}, {transform_indices = @transform_3, window_bounds = array<i64: 1, 8, 8, 8>}, {transform_indices = @transform_4, window_bounds = array<i64: 1, 8, 8>}]} {
    %c0 = arith.constant 0 : index
    %c0_0 = arith.constant 0 : index
    %0 = vector.load %arg3[%c0, %c0_0] : memref<2x8xf32, #tpu.memory_space<vmem>>, vector<2x8xf32>
    %1 = vector.extract_strided_slice %0 {offsets = [0, 0], sizes = [1, 8], strides = [1, 1]} : vector<2x8xf32> to vector<1x8xf32>
    %2 = vector.shape_cast %1 : vector<1x8xf32> to vector<1x1x8xf32>
    %3 = vector.extract_strided_slice %0 {offsets = [1, 0], sizes = [1, 8], strides = [1, 1]} : vector<2x8xf32> to vector<1x8xf32>
    %4 = vector.shape_cast %3 : vector<1x8xf32> to vector<1x1x8xf32>
    %c0_1 = arith.constant 0 : index
    %c0_2 = arith.constant 0 : index
    %c0_3 = arith.constant 0 : index
    %c0_4 = arith.constant 0 : index
    %5 = vector.load %arg1[%c0_1, %c0_2, %c0_3, %c0_4] : memref<1x8x8x8xf32, #tpu.memory_space<vmem>>, vector<1x8x8x8xf32>
    %6 = vector.shape_cast %5 : vector<1x8x8x8xf32> to vector<8x8x8xf32>
    %7 = vector.broadcast %2 : vector<1x1x8xf32> to vector<8x8x8xf32>
    %8 = arith.mulf %6, %7 : vector<8x8x8xf32>
    %9 = vector.broadcast %4 : vector<1x1x8xf32> to vector<8x8x8xf32>
    %10 = arith.addf %8, %9 : vector<8x8x8xf32>
    %cst = arith.constant 0.000000e+00 : f32
    %11 = vector.broadcast %cst : f32 to vector<8x8x8xf32>
    %12 = arith.maximumf %10, %11 : vector<8x8x8xf32>
    %13 = arith.truncf %12 : vector<8x8x8xf32> to vector<8x8x8xbf16>
    %cst_5 = arith.constant 0.000000e+00 : bf16
    %14 = vector.broadcast %cst_5 : bf16 to vector<1x8x8xbf16>
    %cst_6 = arith.constant 0.000000e+00 : bf16
    %15 = vector.broadcast %cst_6 : bf16 to vector<8x1x8xbf16>
    %16 = vector.shape_cast %13 : vector<8x8x8xbf16> to vector<8x1x8x8xbf16>
    %17 = vector.shape_cast %16 : vector<8x1x8x8xbf16> to vector<8x8x8xbf16>
    %18 = vector.extract_strided_slice %17 {offsets = [0, 0, 0], sizes = [7, 8, 8], strides = [1, 1, 1]} : vector<8x8x8xbf16> to vector<7x8x8xbf16>
    %19 = tpu.concatenate %14, %18 in 0 : vector<1x8x8xbf16>, vector<7x8x8xbf16> -> vector<8x8x8xbf16>
    %20 = vector.extract_strided_slice %19 {offsets = [0, 0, 0], sizes = [8, 7, 8], strides = [1, 1, 1]} : vector<8x8x8xbf16> to vector<8x7x8xbf16>
    %21 = tpu.concatenate %15, %20 in 1 : vector<8x1x8xbf16>, vector<8x7x8xbf16> -> vector<8x8x8xbf16>
    %22 = vector.shape_cast %13 : vector<8x8x8xbf16> to vector<8x1x8x8xbf16>
    %23 = vector.shape_cast %22 : vector<8x1x8x8xbf16> to vector<8x8x8xbf16>
    %24 = vector.extract_strided_slice %23 {offsets = [0, 0, 0], sizes = [7, 8, 8], strides = [1, 1, 1]} : vector<8x8x8xbf16> to vector<7x8x8xbf16>
    %25 = tpu.concatenate %14, %24 in 0 : vector<1x8x8xbf16>, vector<7x8x8xbf16> -> vector<8x8x8xbf16>
    %26 = vector.shape_cast %13 : vector<8x8x8xbf16> to vector<8x1x8x8xbf16>
    %27 = vector.shape_cast %26 : vector<8x1x8x8xbf16> to vector<8x8x8xbf16>
    %28 = vector.extract_strided_slice %27 {offsets = [0, 0, 0], sizes = [7, 8, 8], strides = [1, 1, 1]} : vector<8x8x8xbf16> to vector<7x8x8xbf16>
    %29 = tpu.concatenate %14, %28 in 0 : vector<1x8x8xbf16>, vector<7x8x8xbf16> -> vector<8x8x8xbf16>
    %30 = vector.extract_strided_slice %29 {offsets = [0, 1, 0], sizes = [8, 7, 8], strides = [1, 1, 1]} : vector<8x8x8xbf16> to vector<8x7x8xbf16>
    %31 = tpu.concatenate %30, %15 in 1 : vector<8x7x8xbf16>, vector<8x1x8xbf16> -> vector<8x8x8xbf16>
    %32 = vector.shape_cast %13 : vector<8x8x8xbf16> to vector<8x1x8x8xbf16>
    %33 = vector.shape_cast %32 : vector<8x1x8x8xbf16> to vector<8x8x8xbf16>
    %34 = vector.extract_strided_slice %33 {offsets = [0, 0, 0], sizes = [8, 7, 8], strides = [1, 1, 1]} : vector<8x8x8xbf16> to vector<8x7x8xbf16>
    %35 = tpu.concatenate %15, %34 in 1 : vector<8x1x8xbf16>, vector<8x7x8xbf16> -> vector<8x8x8xbf16>
    %36 = vector.shape_cast %13 : vector<8x8x8xbf16> to vector<8x1x8x8xbf16>
    %37 = vector.shape_cast %36 : vector<8x1x8x8xbf16> to vector<8x8x8xbf16>
    %38 = vector.shape_cast %13 : vector<8x8x8xbf16> to vector<8x1x8x8xbf16>
    %39 = vector.shape_cast %38 : vector<8x1x8x8xbf16> to vector<8x8x8xbf16>
    %40 = vector.extract_strided_slice %39 {offsets = [0, 1, 0], sizes = [8, 7, 8], strides = [1, 1, 1]} : vector<8x8x8xbf16> to vector<8x7x8xbf16>
    %41 = tpu.concatenate %40, %15 in 1 : vector<8x7x8xbf16>, vector<8x1x8xbf16> -> vector<8x8x8xbf16>
    %42 = vector.shape_cast %13 : vector<8x8x8xbf16> to vector<8x1x8x8xbf16>
    %43 = vector.shape_cast %42 : vector<8x1x8x8xbf16> to vector<8x8x8xbf16>
    %44 = vector.extract_strided_slice %43 {offsets = [1, 0, 0], sizes = [7, 8, 8], strides = [1, 1, 1]} : vector<8x8x8xbf16> to vector<7x8x8xbf16>
    %45 = tpu.concatenate %44, %14 in 0 : vector<7x8x8xbf16>, vector<1x8x8xbf16> -> vector<8x8x8xbf16>
    %46 = vector.extract_strided_slice %45 {offsets = [0, 0, 0], sizes = [8, 7, 8], strides = [1, 1, 1]} : vector<8x8x8xbf16> to vector<8x7x8xbf16>
    %47 = tpu.concatenate %15, %46 in 1 : vector<8x1x8xbf16>, vector<8x7x8xbf16> -> vector<8x8x8xbf16>
    %48 = vector.shape_cast %13 : vector<8x8x8xbf16> to vector<8x1x8x8xbf16>
    %49 = vector.shape_cast %48 : vector<8x1x8x8xbf16> to vector<8x8x8xbf16>
    %50 = vector.extract_strided_slice %49 {offsets = [1, 0, 0], sizes = [7, 8, 8], strides = [1, 1, 1]} : vector<8x8x8xbf16> to vector<7x8x8xbf16>
    %51 = tpu.concatenate %50, %14 in 0 : vector<7x8x8xbf16>, vector<1x8x8xbf16> -> vector<8x8x8xbf16>
    %52 = vector.shape_cast %13 : vector<8x8x8xbf16> to vector<8x1x8x8xbf16>
    %53 = vector.shape_cast %52 : vector<8x1x8x8xbf16> to vector<8x8x8xbf16>
    %54 = vector.extract_strided_slice %53 {offsets = [1, 0, 0], sizes = [7, 8, 8], strides = [1, 1, 1]} : vector<8x8x8xbf16> to vector<7x8x8xbf16>
    %55 = tpu.concatenate %54, %14 in 0 : vector<7x8x8xbf16>, vector<1x8x8xbf16> -> vector<8x8x8xbf16>
    %56 = vector.extract_strided_slice %55 {offsets = [0, 1, 0], sizes = [8, 7, 8], strides = [1, 1, 1]} : vector<8x8x8xbf16> to vector<8x7x8xbf16>
    %57 = tpu.concatenate %56, %15 in 1 : vector<8x7x8xbf16>, vector<8x1x8xbf16> -> vector<8x8x8xbf16>
    %58 = tpu.concatenate %21, %25, %31, %35, %37, %41, %47, %51, %57 in 2 : vector<8x8x8xbf16>, vector<8x8x8xbf16>, vector<8x8x8xbf16>, vector<8x8x8xbf16>, vector<8x8x8xbf16>, vector<8x8x8xbf16>, vector<8x8x8xbf16>, vector<8x8x8xbf16>, vector<8x8x8xbf16> -> vector<8x8x72xbf16>
    %59 = vector.shape_cast %58 : vector<8x8x72xbf16> to vector<64x72xbf16>
    %c0_7 = arith.constant 0 : index
    %c0_8 = arith.constant 0 : index
    %60 = vector.load %arg2[%c0_7, %c0_8] : memref<72x8xbf16, #tpu.memory_space<vmem>>, vector<72x8xbf16>
    %cst_9 = arith.constant dense<0.000000e+00> : vector<64x8xf32>
    %61 = tpu.matmul %59, %60, %cst_9 {dimension_numbers = #tpu.dot_dimension_numbers<[1], [0], [0], [1], [0, 0, 1, 1], [], []>} : vector<64x72xbf16>, vector<72x8xbf16>, vector<64x8xf32> -> vector<64x8xf32>
    %62 = vector.shape_cast %61 : vector<64x8xf32> to vector<8x8x8xf32>
    %c0_10 = arith.constant 0 : index
    %c0_11 = arith.constant 0 : index
    %c0_12 = arith.constant 0 : index
    %c0_13 = arith.constant 0 : index
    %63 = vector.load %arg4[%c0_10, %c0_11, %c0_12, %c0_13] : memref<1x8x8x8xf32, #tpu.memory_space<vmem>>, vector<1x8x8x8xf32>
    %64 = vector.shape_cast %63 : vector<1x8x8x8xf32> to vector<8x8x8xf32>
    %65 = vector.shape_cast %62 : vector<8x8x8xf32> to vector<1x8x8x8xf32>
    tpu.vector_store %arg4[%c0_10, %c0_11, %c0_12, %c0_13], %65 {strides = array<i32>} : memref<1x8x8x8xf32, #tpu.memory_space<vmem>>, vector<1x8x8x8xf32>,
    %cst_14 = arith.constant dense<0.000000e+00> : vector<8xf32>
    %66 = vector.multi_reduction <add>, %61, %cst_14 [0] : vector<64x8xf32> to vector<8xf32>
    %67 = vector.shape_cast %66 : vector<8xf32> to vector<1x8xf32>
    %68 = arith.mulf %61, %61 : vector<64x8xf32>
    %cst_15 = arith.constant dense<0.000000e+00> : vector<8xf32>
    %69 = vector.multi_reduction <add>, %68, %cst_15 [0] : vector<64x8xf32> to vector<8xf32>
    %70 = vector.shape_cast %69 : vector<8xf32> to vector<1x8xf32>
    %cst_16 = arith.constant 0.000000e+00 : f32
    %71 = vector.broadcast %cst_16 : f32 to vector<6x8xf32>
    %72 = tpu.concatenate %67, %70, %71 in 0 : vector<1x8xf32>, vector<1x8xf32>, vector<6x8xf32> -> vector<8x8xf32>
    %c0_17 = arith.constant 0 : index
    %c0_18 = arith.constant 0 : index
    %c0_19 = arith.constant 0 : index
    %73 = vector.load %arg5[%c0_17, %c0_18, %c0_19] : memref<1x8x8xf32, #tpu.memory_space<vmem>>, vector<1x8x8xf32>
    %74 = vector.shape_cast %73 : vector<1x8x8xf32> to vector<8x8xf32>
    %75 = vector.shape_cast %72 : vector<8x8xf32> to vector<1x8x8xf32>
    tpu.vector_store %arg5[%c0_17, %c0_18, %c0_19], %75 {strides = array<i32>} : memref<1x8x8xf32, #tpu.memory_space<vmem>>, vector<1x8x8xf32>,
    return
  }
  func.func @transform_0(%arg0: i32) -> (i32, i32, i32, i32) {
    %c0_i32 = arith.constant 0 : i32
    %c0_i32_0 = arith.constant 0 : i32
    %c0_i32_1 = arith.constant 0 : i32
    %c0_i32_2 = arith.constant 0 : i32
    return %arg0, %c0_i32, %c0_i32_0, %c0_i32_1 : i32, i32, i32, i32
  }
  func.func @transform_1(%arg0: i32) -> (i32, i32) {
    %c0_i32 = arith.constant 0 : i32
    %c0_i32_0 = arith.constant 0 : i32
    %c0_i32_1 = arith.constant 0 : i32
    return %c0_i32, %c0_i32_0 : i32, i32
  }
  func.func @transform_2(%arg0: i32) -> (i32, i32) {
    %c0_i32 = arith.constant 0 : i32
    %c0_i32_0 = arith.constant 0 : i32
    %c0_i32_1 = arith.constant 0 : i32
    return %c0_i32, %c0_i32_0 : i32, i32
  }
  func.func @transform_3(%arg0: i32) -> (i32, i32, i32, i32) {
    %c0_i32 = arith.constant 0 : i32
    %c0_i32_0 = arith.constant 0 : i32
    %c0_i32_1 = arith.constant 0 : i32
    %c0_i32_2 = arith.constant 0 : i32
    return %arg0, %c0_i32, %c0_i32_0, %c0_i32_1 : i32, i32, i32, i32
  }
  func.func @transform_4(%arg0: i32) -> (i32, i32, i32) {
    %c0_i32 = arith.constant 0 : i32
    %c0_i32_0 = arith.constant 0 : i32
    %c0_i32_1 = arith.constant 0 : i32
    return %arg0, %c0_i32, %c0_i32_0 : i32, i32, i32
  }
}

module attributes {stable_mosaic.version = 11 : i64} {
  func.func @_conv1x1_kernel(%arg0: i32, %arg1: memref<1x16x8x4xbf16, #tpu.memory_space<vmem>>, %arg2: memref<4x8xbf16, #tpu.memory_space<vmem>>, %arg3: memref<1x8x8x8xf32, #tpu.memory_space<vmem>>, %arg4: memref<1x8x8xf32, #tpu.memory_space<vmem>>) attributes {dimension_semantics = [#tpu.dimension_semantics<parallel>], iteration_bounds = array<i64: 2>, scalar_prefetch = 0 : i64, scratch_operands = 0 : i64, tpu.core_type = #tpu.core_type<tc>, window_params = [{transform_indices = @transform_0, window_bounds = array<i64: 1, 16, 8, 4>}, {pipeline_mode = #tpu.pipeline_mode<synchronous>, transform_indices = @transform_1, window_bounds = array<i64: 4, 8>}, {transform_indices = @transform_2, window_bounds = array<i64: 1, 8, 8, 8>}, {transform_indices = @transform_3, window_bounds = array<i64: 1, 8, 8>}]} {
    %c0 = arith.constant 0 : index
    %c0_0 = arith.constant 0 : index
    %c0_1 = arith.constant 0 : index
    %c0_2 = arith.constant 0 : index
    %0 = vector.load %arg1[%c0, %c0_0, %c0_1, %c0_2] : memref<1x16x8x4xbf16, #tpu.memory_space<vmem>>, vector<1x16x8x4xbf16>
    %1 = vector.shape_cast %0 : vector<1x16x8x4xbf16> to vector<16x8x4xbf16>
    %2 = vector.shape_cast %1 : vector<16x8x4xbf16> to vector<8x2x8x4xbf16>
    %3 = vector.extract_strided_slice %2 {offsets = [0, 0, 0, 0], sizes = [8, 1, 8, 4], strides = [1, 1, 1, 1]} : vector<8x2x8x4xbf16> to vector<8x1x8x4xbf16>
    %4 = vector.shape_cast %3 : vector<8x1x8x4xbf16> to vector<8x8x4xbf16>
    %5 = vector.shape_cast %4 : vector<8x8x4xbf16> to vector<64x4xbf16>
    %c0_3 = arith.constant 0 : index
    %c0_4 = arith.constant 0 : index
    %6 = vector.load %arg2[%c0_3, %c0_4] : memref<4x8xbf16, #tpu.memory_space<vmem>>, vector<4x8xbf16>
    %cst = arith.constant dense<0.000000e+00> : vector<64x8xf32>
    %7 = tpu.matmul %5, %6, %cst {dimension_numbers = #tpu.dot_dimension_numbers<[1], [0], [0], [1], [0, 0, 1, 1], [], []>} : vector<64x4xbf16>, vector<4x8xbf16>, vector<64x8xf32> -> vector<64x8xf32>
    %8 = vector.shape_cast %7 : vector<64x8xf32> to vector<8x8x8xf32>
    %c0_5 = arith.constant 0 : index
    %c0_6 = arith.constant 0 : index
    %c0_7 = arith.constant 0 : index
    %c0_8 = arith.constant 0 : index
    %9 = vector.load %arg3[%c0_5, %c0_6, %c0_7, %c0_8] : memref<1x8x8x8xf32, #tpu.memory_space<vmem>>, vector<1x8x8x8xf32>
    %10 = vector.shape_cast %9 : vector<1x8x8x8xf32> to vector<8x8x8xf32>
    %11 = vector.shape_cast %8 : vector<8x8x8xf32> to vector<1x8x8x8xf32>
    tpu.vector_store %arg3[%c0_5, %c0_6, %c0_7, %c0_8], %11 {strides = array<i32>} : memref<1x8x8x8xf32, #tpu.memory_space<vmem>>, vector<1x8x8x8xf32>,
    %cst_9 = arith.constant dense<0.000000e+00> : vector<8xf32>
    %12 = vector.multi_reduction <add>, %7, %cst_9 [0] : vector<64x8xf32> to vector<8xf32>
    %13 = vector.shape_cast %12 : vector<8xf32> to vector<1x8xf32>
    %14 = arith.mulf %7, %7 : vector<64x8xf32>
    %cst_10 = arith.constant dense<0.000000e+00> : vector<8xf32>
    %15 = vector.multi_reduction <add>, %14, %cst_10 [0] : vector<64x8xf32> to vector<8xf32>
    %16 = vector.shape_cast %15 : vector<8xf32> to vector<1x8xf32>
    %cst_11 = arith.constant 0.000000e+00 : f32
    %17 = vector.broadcast %cst_11 : f32 to vector<6x8xf32>
    %18 = tpu.concatenate %13, %16, %17 in 0 : vector<1x8xf32>, vector<1x8xf32>, vector<6x8xf32> -> vector<8x8xf32>
    %c0_12 = arith.constant 0 : index
    %c0_13 = arith.constant 0 : index
    %c0_14 = arith.constant 0 : index
    %19 = vector.load %arg4[%c0_12, %c0_13, %c0_14] : memref<1x8x8xf32, #tpu.memory_space<vmem>>, vector<1x8x8xf32>
    %20 = vector.shape_cast %19 : vector<1x8x8xf32> to vector<8x8xf32>
    %21 = vector.shape_cast %18 : vector<8x8xf32> to vector<1x8x8xf32>
    tpu.vector_store %arg4[%c0_12, %c0_13, %c0_14], %21 {strides = array<i32>} : memref<1x8x8xf32, #tpu.memory_space<vmem>>, vector<1x8x8xf32>,
    return
  }
  func.func @transform_0(%arg0: i32) -> (i32, i32, i32, i32) {
    %c0_i32 = arith.constant 0 : i32
    %c0_i32_0 = arith.constant 0 : i32
    %c0_i32_1 = arith.constant 0 : i32
    %c0_i32_2 = arith.constant 0 : i32
    return %arg0, %c0_i32, %c0_i32_0, %c0_i32_1 : i32, i32, i32, i32
  }
  func.func @transform_1(%arg0: i32) -> (i32, i32) {
    %c0_i32 = arith.constant 0 : i32
    %c0_i32_0 = arith.constant 0 : i32
    %c0_i32_1 = arith.constant 0 : i32
    return %c0_i32, %c0_i32_0 : i32, i32
  }
  func.func @transform_2(%arg0: i32) -> (i32, i32, i32, i32) {
    %c0_i32 = arith.constant 0 : i32
    %c0_i32_0 = arith.constant 0 : i32
    %c0_i32_1 = arith.constant 0 : i32
    %c0_i32_2 = arith.constant 0 : i32
    return %arg0, %c0_i32, %c0_i32_0, %c0_i32_1 : i32, i32, i32, i32
  }
  func.func @transform_3(%arg0: i32) -> (i32, i32, i32) {
    %c0_i32 = arith.constant 0 : i32
    %c0_i32_0 = arith.constant 0 : i32
    %c0_i32_1 = arith.constant 0 : i32
    return %arg0, %c0_i32, %c0_i32_0 : i32, i32, i32
  }
}

module attributes {stable_mosaic.version = 11 : i64} {
  func.func @_bn_add_relu_kernel(%arg0: i32, %arg1: i32, %arg2: memref<1x8x8x8xf32, #tpu.memory_space<vmem>>, %arg3: memref<1x8x8x8xf32, #tpu.memory_space<vmem>>, %arg4: memref<4x8xf32, #tpu.memory_space<vmem>>, %arg5: memref<1x8x8x8xf32, #tpu.memory_space<vmem>>) attributes {dimension_semantics = [#tpu.dimension_semantics<parallel>, #tpu.dimension_semantics<parallel>], iteration_bounds = array<i64: 2, 1>, scalar_prefetch = 0 : i64, scratch_operands = 0 : i64, tpu.core_type = #tpu.core_type<tc>, window_params = [{transform_indices = @transform_0, window_bounds = array<i64: 1, 8, 8, 8>}, {transform_indices = @transform_1, window_bounds = array<i64: 1, 8, 8, 8>}, {pipeline_mode = #tpu.pipeline_mode<synchronous>, transform_indices = @transform_2, window_bounds = array<i64: 4, 8>}, {transform_indices = @transform_3, window_bounds = array<i64: 1, 8, 8, 8>}]} {
    %c0 = arith.constant 0 : index
    %c0_0 = arith.constant 0 : index
    %0 = vector.load %arg4[%c0, %c0_0] : memref<4x8xf32, #tpu.memory_space<vmem>>, vector<4x8xf32>
    %1 = vector.extract_strided_slice %0 {offsets = [0, 0], sizes = [1, 8], strides = [1, 1]} : vector<4x8xf32> to vector<1x8xf32>
    %2 = vector.shape_cast %1 : vector<1x8xf32> to vector<1x1x8xf32>
    %3 = vector.extract_strided_slice %0 {offsets = [1, 0], sizes = [1, 8], strides = [1, 1]} : vector<4x8xf32> to vector<1x8xf32>
    %4 = vector.shape_cast %3 : vector<1x8xf32> to vector<1x1x8xf32>
    %5 = vector.extract_strided_slice %0 {offsets = [2, 0], sizes = [1, 8], strides = [1, 1]} : vector<4x8xf32> to vector<1x8xf32>
    %6 = vector.shape_cast %5 : vector<1x8xf32> to vector<1x1x8xf32>
    %7 = vector.extract_strided_slice %0 {offsets = [3, 0], sizes = [1, 8], strides = [1, 1]} : vector<4x8xf32> to vector<1x8xf32>
    %8 = vector.shape_cast %7 : vector<1x8xf32> to vector<1x1x8xf32>
    %c0_1 = arith.constant 0 : index
    %c0_2 = arith.constant 0 : index
    %c0_3 = arith.constant 0 : index
    %c0_4 = arith.constant 0 : index
    %9 = vector.load %arg2[%c0_1, %c0_2, %c0_3, %c0_4] : memref<1x8x8x8xf32, #tpu.memory_space<vmem>>, vector<1x8x8x8xf32>
    %10 = vector.shape_cast %9 : vector<1x8x8x8xf32> to vector<8x8x8xf32>
    %11 = vector.broadcast %2 : vector<1x1x8xf32> to vector<8x8x8xf32>
    %12 = arith.mulf %10, %11 : vector<8x8x8xf32>
    %13 = vector.broadcast %4 : vector<1x1x8xf32> to vector<8x8x8xf32>
    %14 = arith.addf %12, %13 : vector<8x8x8xf32>
    %c0_5 = arith.constant 0 : index
    %c0_6 = arith.constant 0 : index
    %c0_7 = arith.constant 0 : index
    %c0_8 = arith.constant 0 : index
    %15 = vector.load %arg3[%c0_5, %c0_6, %c0_7, %c0_8] : memref<1x8x8x8xf32, #tpu.memory_space<vmem>>, vector<1x8x8x8xf32>
    %16 = vector.shape_cast %15 : vector<1x8x8x8xf32> to vector<8x8x8xf32>
    %17 = vector.broadcast %6 : vector<1x1x8xf32> to vector<8x8x8xf32>
    %18 = arith.mulf %16, %17 : vector<8x8x8xf32>
    %19 = arith.addf %14, %18 : vector<8x8x8xf32>
    %20 = vector.broadcast %8 : vector<1x1x8xf32> to vector<8x8x8xf32>
    %21 = arith.addf %19, %20 : vector<8x8x8xf32>
    %cst = arith.constant 0.000000e+00 : f32
    %22 = vector.broadcast %cst : f32 to vector<8x8x8xf32>
    %23 = arith.maximumf %21, %22 : vector<8x8x8xf32>
    %c0_9 = arith.constant 0 : index
    %c0_10 = arith.constant 0 : index
    %c0_11 = arith.constant 0 : index
    %c0_12 = arith.constant 0 : index
    %24 = vector.load %arg5[%c0_9, %c0_10, %c0_11, %c0_12] : memref<1x8x8x8xf32, #tpu.memory_space<vmem>>, vector<1x8x8x8xf32>
    %25 = vector.shape_cast %24 : vector<1x8x8x8xf32> to vector<8x8x8xf32>
    %26 = vector.shape_cast %23 : vector<8x8x8xf32> to vector<1x8x8x8xf32>
    tpu.vector_store %arg5[%c0_9, %c0_10, %c0_11, %c0_12], %26 {strides = array<i32>} : memref<1x8x8x8xf32, #tpu.memory_space<vmem>>, vector<1x8x8x8xf32>,
    return
  }
  func.func @transform_0(%arg0: i32, %arg1: i32) -> (i32, i32, i32, i32) {
    %c0_i32 = arith.constant 0 : i32
    %c0_i32_0 = arith.constant 0 : i32
    %c0_i32_1 = arith.constant 0 : i32
    return %arg0, %arg1, %c0_i32, %c0_i32_0 : i32, i32, i32, i32
  }
  func.func @transform_1(%arg0: i32, %arg1: i32) -> (i32, i32, i32, i32) {
    %c0_i32 = arith.constant 0 : i32
    %c0_i32_0 = arith.constant 0 : i32
    %c0_i32_1 = arith.constant 0 : i32
    return %arg0, %arg1, %c0_i32, %c0_i32_0 : i32, i32, i32, i32
  }
  func.func @transform_2(%arg0: i32, %arg1: i32) -> (i32, i32) {
    %c0_i32 = arith.constant 0 : i32
    %c0_i32_0 = arith.constant 0 : i32
    %c0_i32_1 = arith.constant 0 : i32
    return %c0_i32, %c0_i32_0 : i32, i32
  }
  func.func @transform_3(%arg0: i32, %arg1: i32) -> (i32, i32, i32, i32) {
    %c0_i32 = arith.constant 0 : i32
    %c0_i32_0 = arith.constant 0 : i32
    %c0_i32_1 = arith.constant 0 : i32
    return %arg0, %arg1, %c0_i32, %c0_i32_0 : i32, i32, i32, i32
  }
}

</mosaic_0001>

<bundles_post_ra>
// kernel: basic_block_forward.6
= control target key start
LH: loop header
LB: loop body
LE: loop exit
PB: predicated region body
PF: predicated region fallthrough
CT: control target
= control target key end

     0   :  { %s484_s12 = smov 0   ;;  %s552_s0 = inlined_call_operand.vmem [shape: bf16[2,16,8,4], index: 0, kind: input, shape index: {}]   ;;  %s553_s1 = inlined_call_operand.vmem [shape: bf16[4,8], index: 1, kind: input, shape index: {}]   ;;  %s554_s2 = inlined_call_operand.vmem [shape: f32[2,8,8,8], index: 2, kind: output, shape index: {0}]   ;;  %s555_s3 = inlined_call_operand.vmem [shape: f32[2,8,8], index: 3, kind: output, shape index: {1}]  }
   0x1 LB: > { %s407_s13 = sadd.s32 4294967295, %s462_s12   ;;  %p411_p0 = scmp.ge.s32.totalorder %s462_s12, 1  ;;  %s462_s12 = sphi %s484_s12, %s14_s12  }
   0x2   : > { %p140_p1 = scmp.lt.s32.totalorder %s462_s12, 3 }
   0x4   : > { %p141_p2 = pnand %p411_p0, %p140_p1 }
   0x5   : > { %p168_p3 = scmp.lt.s32.totalorder (!%p141_p2), %s407_s13, 1 }
   0x6   : > { %144 = sbr.rel (%p141_p2) target bundleno = 183 (0xb7), region = 28 }
   0xb   : > { %v191_v0 = vld [vmem:[%s553_s1] sm:$0x3]  ;;  %vm225_vm0 = vcmask 1041408   ;;  %s557_s13 = smov (!%p168_p3, %s407_s13), 1  ;;  %vm212_vm1 = vcmask 31744   ;;  %vm258_vm2 = vcmask 64512  }
   0xc   : > { %v227_v1 = vsel %vm225_vm0, %v191_v0, 0  ;;  %s439_s16 = sshll.u32 %s557_s13, 6  ;;  %s416_s23 = sshll.u32 %s557_s13, 3  ;;  %vm317_vm3 = vcmask 1040384  }
   0xd   : > { %236 = vmatpush.bf16.msra.mxu0 %v227_v1  ;;  %445 = vmatpush.bf16.msra.mxu1 %v227_v1  ;;  %s172_s19 = scalar_lea.vmem %s552_s0, %s439_s16  ;;  %s509_s22 = scalar_lea.vmem %s554_s2, %s439_s16 }
   0xe   : > { %446 = vmatpush.bf16.msra.mxu2 %v227_v1  ;;  %447 = vmatpush.bf16.msra.mxu3 %v227_v1  ;;  %v419_v2 = vld [vmem:[%s172_s19] sm:$0xf]  ;;  %v441_v3 = vld [vmem:[%s172_s19 + $0x4] sm:$0xf0]  ;;  %v423_v4 = vld [vmem:[%s172_s19 + $0x10] sm:$0xf]  ;;  %s181_s26 = scalar_lea.vmem %s555_s3, %s416_s23 }
   0xf   : > { %v420_v5 = vor.u32 %v441_v3, %v419_v2  ;;  %v442_v6 = vld [vmem:[%s172_s19 + $0x14] sm:$0xf0]  ;;  %v427_v7 = vld [vmem:[%s172_s19 + $0x20] sm:$0xf]  ;;  %v443_v8 = vld [vmem:[%s172_s19 + $0x24] sm:$0xf0] }
  0x10   : > { %v424_v9 = vor.u32 %v442_v6, %v423_v4  ;;  %v428_v10 = vor.u32 %v443_v8, %v427_v7  ;;  %v431_v11 = vld [vmem:[%s172_s19 + $0x30] sm:$0xf]  ;;  %v444_v12 = vld [vmem:[%s172_s19 + $0x34] sm:$0xf0] }
  0x11   : > { %433 = vmatmul.msk.bf16.vlgmr.msra.gmra.mxu0 %vm212_vm1, %v420_v5  ;;  %v432_v13 = vor.u32 %v444_v12, %v431_v11 }
  0x12   : > { %434 = vmatmul.msk.bf16.vlgmr.msra.gmra.mxu1 %vm212_vm1, %v424_v9  ;;  %435 = vmatmul.msk.bf16.vlgmr.msra.gmra.mxu2 %vm212_vm1, %v428_v10 }
  0x13   : > { %436 = vmatmul.msk.bf16.vlgmr.msra.gmra.mxu3 %vm212_vm1, %v432_v13 }
  0x8e   : > { %v238_v14 = vpop.f32.mrf.mxu0 }
  0x8f   : > { %259 = vst.msk [vmem:[%s509_s22] sm:$0xff] %vm258_vm2, %v238_v14  ;;  %v243_v15 = vpop.f32.mrf.mxu1  ;;  %v288_v16 = vmul.f32 %v238_v14, %v238_v14  ;;  %v267_v20 = vsel %vm258_vm2, %v238_v14, 0.0 }
  0x90   : > { %261 = vst.msk [vmem:[%s509_s22 + $0x10] sm:$0xff] %vm258_vm2, %v243_v15  ;;  %v290_v21 = vmul.f32 %v243_v15, %v243_v15  ;;  %v270_v27 = vsel %vm258_vm2, %v243_v15, 0.0 }
  0x91   : > { %v296_v26 = vsel %vm258_vm2, %v288_v16, 0.0 }
  0x92   : > { %v299_v32 = vsel %vm258_vm2, %v290_v21, 0.0 }
  0x95   : > { %v248_v17 = vpop.f32.mrf.mxu2 }
  0x96   : > { %263 = vst.msk [vmem:[%s509_s22 + $0x20] sm:$0xff] %vm258_vm2, %v248_v17  ;;  %v253_v18 = vpop.f32.mrf.mxu3  ;;  %v240_v19 = vpop.f32.mrf.mxu0  ;;  %v292_v33 = vmul.f32 %v248_v17, %v248_v17  ;;  %v274_v37 = vsel %vm258_vm2, %v248_v17, 0.0 }
  0x97   : > { %265 = vst.msk [vmem:[%s509_s22 + $0x30] sm:$0xff] %vm258_vm2, %v253_v18  ;;  %v268_v22 = vsel %vm258_vm2, %v240_v19, 0.0  ;;  %v289_v23 = vmul.f32 %v240_v19, %v240_v19  ;;  %v245_v24 = vpop.f32.mrf.mxu1  ;;  %v294_v45 = vmul.f32 %v253_v18, %v253_v18  ;;  %v278_v49 = vsel %vm258_vm2, %v253_v18, 0.0 }
  0x98   : > { %260 = vst.msk [vmem:[%s509_s22 + $0x8] sm:$0xff] %vm258_vm2, %v240_v19  ;;  %v269_v25 = vadd.f32 %v268_v22, %v267_v20  ;;  %v291_v29 = vmul.f32 %v245_v24, %v245_v24  ;;  %v272_v34 = vsel %vm258_vm2, %v245_v24, 0.0  ;;  %v303_v44 = vsel %vm258_vm2, %v292_v33, 0.0 }
  0x99   : > { %v297_v28 = vsel %vm258_vm2, %v289_v23, 0.0  ;;  %262 = vst.msk [vmem:[%s509_s22 + $0x18] sm:$0xff] %vm258_vm2, %v245_v24  ;;  %v307_v54 = vsel %vm258_vm2, %v294_v45, 0.0 }
  0x9a   : > { %v298_v30 = vadd.f32 %v297_v28, %v296_v26  ;;  %v271_v31 = vadd.f32 %v270_v27, %v269_v25  ;;  %v301_v38 = vsel %vm258_vm2, %v291_v29, 0.0 }
  0x9c   : > { %v273_v35 = vadd.f32 %v272_v34, %v271_v31  ;;  %v300_v36 = vadd.f32 %v299_v32, %v298_v30 }
  0x9d   : > { %v250_v39 = vpop.f32.mrf.mxu2 }
  0x9e   : > { %v302_v40 = vadd.f32 %v301_v38, %v300_v36  ;;  %264 = vst.msk [vmem:[%s509_s22 + $0x28] sm:$0xff] %vm258_vm2, %v250_v39  ;;  %v275_v41 = vadd.f32 %v274_v37, %v273_v35  ;;  %v293_v42 = vmul.f32 %v250_v39, %v250_v39  ;;  %v255_v43 = vpop.f32.mrf.mxu3  ;;  %v276_v46 = vsel %vm258_vm2, %v250_v39, 0.0 }
  0x9f   : > { %266 = vst.msk [vmem:[%s509_s22 + $0x38] sm:$0xff] %vm258_vm2, %v255_v43  ;;  %v295_v51 = vmul.f32 %v255_v43, %v255_v43  ;;  %v280_v55 = vsel %vm258_vm2, %v255_v43, 0.0 }
  0xa0   : > { %v277_v47 = vadd.f32 %v276_v46, %v275_v41  ;;  %v304_v48 = vadd.f32 %v303_v44, %v302_v40  ;;  %v305_v50 = vsel %vm258_vm2, %v293_v42, 0.0 }
  0xa1   : > { %v309_v58 = vsel %vm258_vm2, %v295_v51, 0.0 }
  0xa2   : > { %v306_v52 = vadd.f32 %v305_v50, %v304_v48  ;;  %v279_v53 = vadd.f32 %v278_v49, %v277_v47 }
  0xa4   : > { %v281_v56 = vadd.f32 %v280_v55, %v279_v53  ;;  %v308_v57 = vadd.f32 %v307_v54, %v306_v52 }
  0xa6   : > { %v282_v59 = vrot.slane %v281_v56, 4  ;;  %v310_v60 = vadd.f32 %v309_v58, %v308_v57 }
  0xa8   : > { %v283_v61 = vadd.f32 %v282_v59, %v281_v56  ;;  %v311_v62 = vrot.slane %v310_v60, 4 }
  0xaa   : > { %v284_v63 = vrot.slane %v283_v61, 2  ;;  %v312_v0 = vadd.f32 %v311_v62, %v310_v60 }
  0xac   : > { %v285_v1 = vadd.f32 %v284_v63, %v283_v61  ;;  %v313_v2 = vrot.slane %v312_v0, 2 }
  0xae   : > { %v286_v3 = vrot.slane %v285_v1, 1  ;;  %v314_v4 = vadd.f32 %v313_v2, %v312_v0 }
  0xb0   : > { %v315_v5 = vrot.slane %v314_v4, 1  ;;  %v287_v6 = vadd.f32 %v286_v3, %v285_v1 }
  0xb2   : > { %v316_v7 = vadd.f32 %v315_v5, %v314_v4 }
  0xb4   : > { %v318_v8 = vsel %vm317_vm3, %v287_v6, %v316_v7 }
  0xb5   : > { %v319_v9 = vsel %vm225_vm0, %v318_v8, 0.0 }
  0xb6   : > { %320 = vst.msk [vmem:[%s181_s26] sm:$0xff] %vm258_vm2, %v319_v9 }
  0xb7 PF: > { %s14_s12 = sadd.s32 1, %s462_s12  }
  0xb8   : > { %p11_p4 = scmp.ge.s32.totalorder %s14_s12, 4  }
  0xba   :  { %13 = sbr.rel (!%p11_p4) target bundleno = 1 (0x1), region = 70 }

// kernel: basic_block_forward.7
= control target key start
LH: loop header
LB: loop body
LE: loop exit
PB: predicated region body
PF: predicated region fallthrough
CT: control target
= control target key end

     0   :  { %s513_s12 = smov 0   ;;  %s515_s13 = smov 0   ;;  %s605_s0 = inlined_call_operand.vmem [shape: f32[2,8,8,8], index: 0, kind: input, shape index: {}]   ;;  %s606_s1 = inlined_call_operand.vmem [shape: f32[2,8,8,8], index: 1, kind: input, shape index: {}]   ;;  %s607_s2 = inlined_call_operand.vmem [shape: f32[4,8], index: 2, kind: input, shape index: {}]   ;;  %s608_s3 = inlined_call_operand.vmem [shape: f32[2,8,8,8], index: 3, kind: output, shape index: {}]  }
   0x1   :  { %s517_s14 = smov 0  }
   0x2 LB: > { %s25_s15 = sadd.s32 1, %s487_s13  ;;  %p433_p0 = scmp.ge.s32.totalorder %s491_s14, 1  ;;  %s491_s14 = sphi %s517_s14, %s13_s14   ;;  %s487_s13 = sphi %s515_s13, %s610_s13   ;;  %s483_s12 = sphi %s513_s12, %s609_s12  }
   0x3   : > { %p27_p1 = scmp.ge.s32.totalorder %s25_s15, 2  ;;  %p175_p2 = scmp.lt.s32.totalorder %s491_s14, 3 }
   0x5   : > { %s612_s15 = smov (%p27_p1, %s25_s15), 0  ;;  %p176_p3 = pnand %p433_p0, %p175_p2 }
   0x6   : > { %p217_p4 = scmp.lt.s32.totalorder (!%p176_p3), %s483_s12, 1 }
   0x7   : > { %179 = sbr.rel (%p176_p3) target bundleno = 35 (0x23), region = 32 }
   0xc   : > { %v246_v0 = vld [vmem:[%s607_s2] sm:$0xf]  ;;  %s614_s12 = smov (!%p217_p4, %s483_s12), 1  ;;  %vm315_vm0 = vcmask 64512  }
   0xd   : > { %v255_v1 = vperm.slane %v246_v0, 0  ;;  %v534_v2 = vperm.slane %v246_v0, 2  ;;  %s536_s18 = sshll.u32 %s614_s12, 6  ;;  %v264_v3 = vperm.slane %v246_v0, 1  ;;  %v298_v13 = vperm.slane %v246_v0, 3 }
   0xe   : > { %s542_s21 = scalar_lea.vmem %s605_s0, %s536_s18  ;;  %s548_s24 = scalar_lea.vmem %s606_s1, %s536_s18 }
   0xf   : > { %v247_v4 = vld [vmem:[%s542_s21] sm:$0xff]  ;;  %v248_v6 = vld [vmem:[%s542_s21 + $0x8] sm:$0xff]  ;;  %v249_v11 = vld [vmem:[%s542_s21 + $0x10] sm:$0xff]  ;;  %s576_s27 = scalar_lea.vmem %s608_s3, %s536_s18 }
  0x10   : > { %v273_v5 = vld [vmem:[%s548_s24] sm:$0xff]  ;;  %v256_v7 = vmul.f32 %v255_v1, %v247_v4  ;;  %v257_v9 = vmul.f32 %v255_v1, %v248_v6  ;;  %v274_v10 = vld [vmem:[%s548_s24 + $0x8] sm:$0xff]  ;;  %v275_v12 = vld [vmem:[%s548_s24 + $0x10] sm:$0xff]  ;;  %v258_v15 = vmul.f32 %v255_v1, %v249_v11 }
  0x11   : > { %v282_v8 = vmul.f32 %v534_v2, %v273_v5  ;;  %v283_v14 = vmul.f32 %v534_v2, %v274_v10  ;;  %v284_v16 = vmul.f32 %v534_v2, %v275_v12  ;;  %v250_v17 = vld [vmem:[%s542_s21 + $0x18] sm:$0xff]  ;;  %v251_v19 = vld [vmem:[%s542_s21 + $0x20] sm:$0xff]  ;;  %v252_v25 = vld [vmem:[%s542_s21 + $0x28] sm:$0xff] }
  0x12   : > { %v276_v18 = vld [vmem:[%s548_s24 + $0x18] sm:$0xff]  ;;  %v265_v20 = vadd.f32 %v264_v3, %v256_v7  ;;  %v266_v21 = vadd.f32 %v264_v3, %v257_v9  ;;  %v259_v22 = vmul.f32 %v255_v1, %v250_v17  ;;  %v277_v24 = vld [vmem:[%s548_s24 + $0x20] sm:$0xff]  ;;  %v278_v26 = vld [vmem:[%s548_s24 + $0x28] sm:$0xff]  ;;  %v267_v27 = vadd.f32 %v264_v3, %v258_v15 }
  0x13   : > { %v285_v23 = vmul.f32 %v534_v2, %v276_v18  ;;  %v260_v28 = vmul.f32 %v255_v1, %v251_v19  ;;  %v286_v29 = vmul.f32 %v534_v2, %v277_v24  ;;  %v261_v30 = vmul.f32 %v255_v1, %v252_v25  ;;  %v253_v31 = vld [vmem:[%s542_s21 + $0x30] sm:$0xff]  ;;  %v254_v41 = vld [vmem:[%s542_s21 + $0x38] sm:$0xff] }
  0x14   : > { %v279_v32 = vld [vmem:[%s548_s24 + $0x30] sm:$0xff]  ;;  %v290_v33 = vadd.f32 %v282_v8, %v265_v20  ;;  %v291_v34 = vadd.f32 %v283_v14, %v266_v21  ;;  %v268_v35 = vadd.f32 %v264_v3, %v259_v22  ;;  %v287_v36 = vmul.f32 %v534_v2, %v278_v26  ;;  %v280_v50 = vld [vmem:[%s548_s24 + $0x38] sm:$0xff] }
  0x15   : > { %v292_v37 = vadd.f32 %v284_v16, %v267_v27  ;;  %v269_v38 = vadd.f32 %v264_v3, %v260_v28  ;;  %v270_v39 = vadd.f32 %v264_v3, %v261_v30  ;;  %v262_v40 = vmul.f32 %v255_v1, %v253_v31 }
  0x16   : > { %v299_v42 = vadd.f32 %v298_v13, %v290_v33  ;;  %v300_v43 = vadd.f32 %v298_v13, %v291_v34  ;;  %v293_v44 = vadd.f32 %v285_v23, %v268_v35  ;;  %v288_v45 = vmul.f32 %v534_v2, %v279_v32 }
  0x17   : > { %v301_v46 = vadd.f32 %v298_v13, %v292_v37  ;;  %v294_v47 = vadd.f32 %v286_v29, %v269_v38  ;;  %v295_v48 = vadd.f32 %v287_v36, %v270_v39  ;;  %v271_v49 = vadd.f32 %v264_v3, %v262_v40 }
  0x18   : > { %v307_v51 = vmax.f32 %v299_v42, 0.0  ;;  %v308_v52 = vmax.f32 %v300_v43, 0.0  ;;  %v302_v53 = vadd.f32 %v298_v13, %v293_v44  ;;  %v263_v54 = vmul.f32 %v255_v1, %v254_v41 }
  0x19   : > { %v309_v55 = vmax.f32 %v301_v46, 0.0  ;;  %v303_v56 = vadd.f32 %v298_v13, %v294_v47  ;;  %v304_v57 = vadd.f32 %v298_v13, %v295_v48  ;;  %v296_v58 = vadd.f32 %v288_v45, %v271_v49 }
  0x1a   : > { %316 = vst.msk [vmem:[%s576_s27] sm:$0xff] %vm315_vm0, %v307_v51  ;;  %v310_v59 = vmax.f32 %v302_v53, 0.0  ;;  %v272_v60 = vadd.f32 %v264_v3, %v263_v54  ;;  %v289_v61 = vmul.f32 %v534_v2, %v280_v50 }
  0x1b   : > { %317 = vst.msk [vmem:[%s576_s27 + $0x8] sm:$0xff] %vm315_vm0, %v308_v52  ;;  %v311_v62 = vmax.f32 %v303_v56, 0.0  ;;  %v312_v63 = vmax.f32 %v304_v57, 0.0  ;;  %v305_v0 = vadd.f32 %v298_v13, %v296_v58 }
  0x1c   : > { %318 = vst.msk [vmem:[%s576_s27 + $0x10] sm:$0xff] %vm315_vm0, %v309_v55  ;;  %v297_v1 = vadd.f32 %v289_v61, %v272_v60 }
  0x1d   : > { %319 = vst.msk [vmem:[%s576_s27 + $0x18] sm:$0xff] %vm315_vm0, %v310_v59  ;;  %v313_v4 = vmax.f32 %v305_v0, 0.0 }
  0x1e   : > { %320 = vst.msk [vmem:[%s576_s27 + $0x20] sm:$0xff] %vm315_vm0, %v311_v62  ;;  %v306_v5 = vadd.f32 %v298_v13, %v297_v1 }
  0x1f   : > { %321 = vst.msk [vmem:[%s576_s27 + $0x28] sm:$0xff] %vm315_vm0, %v312_v63 }
  0x20   : > { %322 = vst.msk [vmem:[%s576_s27 + $0x30] sm:$0xff] %vm315_vm0, %v313_v4  ;;  %v314_v3 = vmax.f32 %v306_v5, 0.0 }
  0x22   : > { %323 = vst.msk [vmem:[%s576_s27 + $0x38] sm:$0xff] %vm315_vm0, %v314_v3 }
  0x23 PF: > { %s13_s14 = sadd.s32 1, %s491_s14   ;;  %s609_s12 = smov %s487_s13 }
  0x24   : > { %p10_p5 = scmp.ge.s32.totalorder %s13_s14, 4   ;;  %s610_s13 = smov %s612_s15 }
  0x26   :  { %12 = sbr.rel (!%p10_p5) target bundleno = 2 (0x2), region = 65 }

// kernel: basic_block_forward.4
= control target key start
LH: loop header
LB: loop body
LE: loop exit
PB: predicated region body
PF: predicated region fallthrough
CT: control target
= control target key end

     0   :  { %s1221_s15 = smov 0   ;;  %s1714_s0 = inlined_call_operand.vmem [shape: bf16[2,16,8,4], index: 0, kind: input, shape index: {}]   ;;  %s1715_s1 = inlined_call_operand.vmem [shape: bf16[2,16,8,4], index: 1, kind: input, shape index: {}]   ;;  %s1716_s2 = inlined_call_operand.vmem [shape: bf16[36,8], index: 2, kind: input, shape index: {}]   ;;  %s1717_s3 = inlined_call_operand.vmem [shape: f32[2,8,8,8], index: 3, kind: output, shape index: {0}]   ;;  %s1718_s4 = inlined_call_operand.vmem [shape: f32[2,8,8], index: 4, kind: output, shape index: {1}]  }
   0x1 LB: > { %s1112_s16 = sadd.s32 4294967295, %s1185_s15   ;;  %p1116_p0 = scmp.ge.s32.totalorder %s1185_s15, 1  ;;  %s1185_s15 = sphi %s1221_s15, %s15_s15  }
   0x2   : > { %p175_p1 = scmp.lt.s32.totalorder %s1185_s15, 3 }
   0x4   : > { %p176_p2 = pnand %p1116_p0, %p175_p1 }
   0x5   : > { %s1188_s17 = smov (!%p176_p2), 8   ;;  %s1189_s18 = smov (!%p176_p2), 4  }
   0x6   : > { %179 = sbr.rel (%p176_p2) target bundleno = 460 (0x1cc), region = 32  ;;  %p210_p3 = scmp.lt.s32.totalorder (!%p176_p2), %s1112_s16, 1 }
   0x7   : > { %s1190_s26 = smov (!%p176_p2), 12   ;;  %s1191_s27 = smov (!%p176_p2), 16  }
   0x8   : > { %s1192_s28 = smov (!%p176_p2), 20   ;;  %s1193_s29 = smov (!%p176_p2), 24  }
   0x9   : > { %s1194_s30 = smov (!%p176_p2), 28   ;;  %s1195_s5 = smov (!%p176_p2), 32  }
   0xb   : > { %v1187_v0 = vmov 0   ;;  %s1722_s16 = smov (!%p210_p3, %s1112_s16), 1  ;;  %vm326_vm0 = vcmask 1040384   ;;  %vm327_vm1 = vsmask.f32 256  ;;  %vm722_vm3 = vcmask 31744  }
   0xc   : > { %553 = vrot.lane.b32.xlu1 %v1187_v0, %s1188_s17  ;;  %537 = vrot.lane.b32.xlu0 %v1187_v0, %s1189_s18  ;;  %s1236_s19 = sshll.u32 %s1722_s16, 6  ;;  %vm1278_vm2 = vmand %vm326_vm0, %vm327_vm1  ;;  %vm747_vm4 = vcmask 64512   ;;  %vm764_vm5 = vcmask 97280   ;;  %vm781_vm6 = vcmask 130048   ;;  %vm919_vm7 = vcmask 1041408   ;;  %v1142_v17 = vld [vmem:[%s1716_s2 + $0x8] sm:$0xff] }
   0xd   : > { %s1242_s22 = scalar_lea.vmem %s1714_s0, %s1236_s19  ;;  %s1248_s25 = scalar_lea.vmem %s1715_s1, %s1236_s19  ;;  %vm798_vm8 = vcmask 162816   ;;  %vm832_vm9 = vcmask 228352   ;;  %vm815_vm10 = vcmask 195584   ;;  %vm849_vm11 = vcmask 261120  }
   0xe   : > { %v1251_v1 = vld [vmem:[%s1242_s22 + $0x1c] sm:$0xf]  ;;  %v1254_v2 = vld [vmem:[%s1248_s25 + $0x4] sm:$0xf]  ;;  %v248_v4 = vld [vmem:[%s1248_s25 + $0x8] sm:$0xf]  ;;  %s1670_s14 = scalar_lea.vmem %s1717_s3, %s1236_s19 }
   0xf   : > { %v1257_v3 = vld [vmem:[%s1242_s22 + $0x4] sm:$0xf]  ;;  %545 = vrot.lane.b32.xlu2 %v1251_v1, %s1189_s18  ;;  %v346_v5 = vunpack.c.l.b16 %v248_v4  ;;  %v246_v6 = vld [vmem:[%s1248_s25] sm:$0xf]  ;;  %v256_v24 = vld [vmem:[%s1248_s25 + $0x28] sm:$0xf]  ;;  %v441_v45 = vunpack.c.l.b16 %v1254_v2 }
  0x10   : > { %v345_v7 = vunpack.c.l.b16 %v246_v6  ;;  %v1270_v10 = vld [vmem:[%s1242_s22 + $0x24] sm:$0xf]  ;;  %v254_v15 = vld [vmem:[%s1248_s25 + $0x20] sm:$0xf]  ;;  %v1291_v27 = vld [vmem:[%s1248_s25 + $0x1c] sm:$0xf]  ;;  %v350_v30 = vunpack.c.l.b16 %v256_v24 }
  0x11   : > { %v1267_v8 = vpack.c.b16 %v346_v5, %v346_v5  ;;  %v230_v20 = vld [vmem:[%s1242_s22] sm:$0xf]  ;;  %v349_v21 = vunpack.c.l.b16 %v254_v15  ;;  %v232_v28 = vld [vmem:[%s1242_s22 + $0x8] sm:$0xf]  ;;  %v1300_v34 = vld [vmem:[%s1248_s25 + $0x24] sm:$0xf]  ;;  %v1328_v49 = vpack.c.b16 %v441_v45, %v441_v45 }
  0x12   : > { %v353_v9 = vpack.c.b16 %v345_v7, %v345_v7  ;;  %v601_v26 = vunpack.c.l.b16 %v230_v20  ;;  %v602_v32 = vunpack.c.l.b16 %v232_v28  ;;  %v1302_v35 = vpack.c.b16 %v350_v30, %v350_v30  ;;  %v1311_v40 = vld [vmem:[%s1242_s22 + $0x14] sm:$0xf]  ;;  %v1314_v42 = vld [vmem:[%s1242_s22 + $0xc] sm:$0xf]  ;;  %v238_v53 = vld [vmem:[%s1242_s22 + $0x20] sm:$0xf] }
  0x13   : > { %v369_v11 = vshrl.u32 %v1267_v8, 16  ;;  %v372_v12 = vshll.u32 %v1267_v8, 16  ;;  %v1294_v29 = vpack.c.b16 %v349_v21, %v349_v21  ;;  %v1326_v48 = vld [vmem:[%s1248_s25 + $0xc] sm:$0xf]  ;;  %v458_v54 = vshrl.u32 %v1328_v49, 16 }
  0x14   : > { %555 = vrot.lane.b32.xlu1 %v1254_v2, %s1188_s17  ;;  %539 = vrot.lane.b32.xlu0 %v1257_v3, %s1189_s18  ;;  %v362_v13 = vshrl.u32 %v353_v9, 16  ;;  %v365_v14 = vshll.u32 %v353_v9, 16  ;;  %v609_v31 = vpack.c.b16 %v601_v26, %v601_v26  ;;  %v610_v36 = vpack.c.b16 %v602_v32, %v602_v32  ;;  %v250_v55 = vld [vmem:[%s1248_s25 + $0x10] sm:$0xf]  ;;  %v1343_v56 = vld [vmem:[%s1248_s25 + $0x14] sm:$0xf] }
  0x15   : > { %v371_v16 = vrot.slane %v369_v11, 7  ;;  %v390_v33 = vshrl.u32 %v1294_v29, 16  ;;  %v393_v38 = vshll.u32 %v1294_v29, 16  ;;  %v397_v39 = vshrl.u32 %v1302_v35, 16  ;;  %v240_v58 = vld [vmem:[%s1242_s22 + $0x28] sm:$0xf] }
  0x16   : > { %v364_v18 = vrot.slane %v362_v13, 7  ;;  %v400_v44 = vshll.u32 %v1302_v35, 16  ;;  %v442_v50 = vunpack.c.l.b16 %v1326_v48  ;;  %v605_v57 = vunpack.c.l.b16 %v238_v53  ;;  %v252_v63 = vld [vmem:[%s1248_s25 + $0x18] sm:$0xf]  ;;  %v1373_v24 = vld [vmem:[%s1242_s22 + $0x2c] sm:$0xf] }
  0x17   : > { %547 = vrot.lane.b32.xlu2 %v1270_v10, %s1189_s18  ;;  %v374_v19 = vor.u32 %v372_v12, %v371_v16  ;;  %v392_v37 = vrot.slane %v390_v33, 7  ;;  %v399_v43 = vrot.slane %v397_v39, 7  ;;  %v460_v59 = vrot.slane %v458_v54, 7  ;;  %v1386_v32 = vld [vmem:[%s1248_s25 + $0x2c] sm:$0xf] }
  0x18   : > { %v367_v22 = vor.u32 %v365_v14, %v364_v18  ;;  %v1335_v52 = vpack.c.b16 %v442_v50, %v442_v50  ;;  %v461_v60 = vshll.u32 %v1328_v49, 16  ;;  %v347_v62 = vunpack.c.l.b16 %v250_v55 }
  0x19   : > { %v426_v23 = vsel %vm1278_vm2, 0, %v374_v19  ;;  %v395_v41 = vor.u32 %v393_v38, %v392_v37  ;;  %v402_v47 = vor.u32 %v400_v44, %v399_v43  ;;  %v613_v4 = vpack.c.b16 %v605_v57, %v605_v57 }
  0x1a   : > { %v425_v25 = vsel %vm1278_vm2, 0, %v367_v22  ;;  %v465_v61 = vshrl.u32 %v1335_v52, 16  ;;  %v606_v5 = vunpack.c.l.b16 %v240_v58  ;;  %v463_v6 = vor.u32 %v461_v60, %v460_v59  ;;  %v1370_v22 = vld [vmem:[%s1242_s22 + $0x34] sm:$0xf] }
  0x1b   : > { %v429_v46 = vsel %vm1278_vm2, 0, %v395_v41  ;;  %v430_v51 = vsel %vm1278_vm2, 0, %v402_v47  ;;  %v348_v11 = vunpack.c.l.b16 %v252_v63  ;;  %v675_v33 = vunpack.c.l.b16 %v1314_v42 }
  0x1c   : > { %579 = vrot.lane.b32.xlu1 %v426_v23, %s1190_s26  ;;  %577 = vrot.lane.b32.xlu0 %v425_v25, %s1190_s26  ;;  %v467_v7 = vrot.slane %v465_v61, 7  ;;  %v614_v12 = vpack.c.b16 %v606_v5, %v606_v5  ;;  %v521_v13 = vsel %vm1278_vm2, 0, %v463_v6  ;;  %v446_v37 = vunpack.c.l.b16 %v1386_v32 }
  0x1d   : > { %v1360_v16 = vpack.c.b16 %v348_v11, %v348_v11  ;;  %v445_v38 = vunpack.c.l.b16 %v1300_v34  ;;  %v683_v39 = vpack.c.b16 %v675_v33, %v675_v33  ;;  %v294_v53 = vshll.u32 %v1291_v27, 16 }
  0x1e   : > { %v1397_v43 = vpack.c.b16 %v446_v37, %v446_v37  ;;  %v298_v5 = vshrl.u32 %v1300_v34, 16  ;;  %vm906_vm12 = vcmask 293888  }
  0x1f   : > { %561 = vrot.lane.b32.xlu2 %v1291_v27, %s1188_s17  ;;  %v383_v21 = vshrl.u32 %v1360_v16, 16  ;;  %v386_v26 = vshll.u32 %v1360_v16, 16  ;;  %v1400_v44 = vpack.c.b16 %v445_v38, %v445_v38 }
  0x20   : > { %v493_v47 = vshrl.u32 %v1397_v43, 16  ;;  %v496_v59 = vshll.u32 %v1397_v43, 16 }
  0x21   : > { %v385_v25 = vrot.slane %v383_v21, 7  ;;  %v486_v50 = vshrl.u32 %v1400_v44, 16 }
  0x22   : > { %v495_v58 = vrot.slane %v493_v47, 7  ;;  %v273_v47 = vshll.u32 %v1254_v2, 16 }
  0x23   : > { %v388_v30 = vor.u32 %v386_v26, %v385_v25  ;;  %v488_v63 = vrot.slane %v486_v50, 7 }
  0x24   : > { %617 = vrot.lane.b32.xlu1 %v609_v31, %s1191_s27  ;;  %563 = vrot.lane.b32.xlu0 %v1300_v34, %s1188_s17 }
  0x25   : > { %v428_v31 = vsel %vm1278_vm2, 0, %v388_v30 }
  0x27   : > { %619 = vrot.lane.b32.xlu2 %v610_v36, %s1191_s27  ;;  %v674_v36 = vunpack.c.l.b16 %v1257_v3  ;;  %v291_v3 = vshrl.u32 %v1291_v27, 16 }
  0x29   : > { %v682_v41 = vpack.c.b16 %v674_v36, %v674_v36  ;;  %v293_v57 = vrot.slane %v291_v3, 7 }
  0x2c   : > { %543 = vrot.lane.b32.xlu1 %v1311_v40, %s1189_s18  ;;  %541 = vrot.lane.b32.xlu0 %v1314_v42, %s1189_s18  ;;  %v234_v42 = vld [vmem:[%s1242_s22 + $0x10] sm:$0xf] }
  0x2d   : > { %v603_v45 = vunpack.c.l.b16 %v234_v42  ;;  %v265_v42 = vrot.slane %v1187_v0, 7 }
  0x2f   : > { %585 = vrot.lane.b32.xlu2 %v429_v46, %s1190_s26  ;;  %v236_v46 = vld [vmem:[%s1242_s22 + $0x18] sm:$0xf]  ;;  %v611_v54 = vpack.c.b16 %v603_v45, %v603_v45  ;;  %v443_v45 = vunpack.c.l.b16 %v1343_v56  ;;  %v329_v0 = vsel %vm1278_vm2, 0, %v265_v42 }
  0x30   : > { %v604_v55 = vunpack.c.l.b16 %v236_v46  ;;  %v678_v46 = vunpack.c.l.b16 %v1270_v10 }
  0x32   : > { %v612_v6 = vpack.c.b16 %v604_v55, %v604_v55 }
  0x34   : > { %633 = vrot.lane.b32.xlu1 %v353_v9, %s1192_s28  ;;  %587 = vrot.lane.b32.xlu0 %v430_v51, %s1190_s26  ;;  %v1354_v9 = vpack.c.b16 %v347_v62, %v347_v62  ;;  %v1410_v51 = vld [vmem:[%s1248_s25 + $0x38] sm:$0xff]   ;;  %v1420_v62 = vld [vmem:[%s1248_s25 + $0x34] sm:$0xf] }
  0x35   : > { %v1149_v61 = vunpack.c.l.b16 %v1410_v51 }
  0x36   : > { %v376_v15 = vshrl.u32 %v1354_v9, 16  ;;  %v379_v20 = vshll.u32 %v1354_v9, 16 }
  0x37   : > { %635 = vrot.lane.b32.xlu2 %v1267_v8, %s1192_s28  ;;  %v468_v8 = vshll.u32 %v1335_v52, 16 }
  0x38   : > { %v378_v19 = vrot.slane %v376_v15, 7 }
  0x39   : > { %v470_v14 = vor.u32 %v468_v8, %v467_v7  ;;  %v296_v7 = vor.u32 %v294_v53, %v293_v57  ;;  %v498_v8 = vor.u32 %v496_v59, %v495_v58  ;;  %v686_v57 = vpack.c.b16 %v678_v46, %v678_v46 }
  0x3a   : > { %v381_v23 = vor.u32 %v379_v20, %v378_v19  ;;  %v679_v59 = vunpack.c.l.b16 %v1373_v24 }
  0x3b   : > { %v522_v18 = vsel %vm1278_vm2, 0, %v470_v14  ;;  %v301_v14 = vshll.u32 %v1300_v34, 16  ;;  %v333_v15 = vsel %vm1278_vm2, 0, %v296_v7  ;;  %v526_v19 = vsel %vm1278_vm2, 0, %v498_v8 }
  0x3c   : > { %559 = vrot.lane.b32.xlu1 %v1343_v56, %s1188_s17  ;;  %557 = vrot.lane.b32.xlu0 %v1326_v48, %s1188_s17  ;;  %v427_v28 = vsel %vm1278_vm2, 0, %v381_v23  ;;  %v687_v8 = vpack.c.b16 %v679_v59, %v679_v59 }
  0x3f   : > { %625 = vrot.lane.b32.xlu2 %v613_v4, %s1191_s27  ;;  %v489_v4 = vshll.u32 %v1400_v44, 16 }
  0x44   : > { %657 = vrot.lane.b32.xlu1 %v521_v13, %s1193_s29  ;;  %627 = vrot.lane.b32.xlu0 %v614_v12, %s1191_s27  ;;  %v1428_v12 = vpack.c.b16 %v1149_v61, %v1149_v61  ;;  %v491_v13 = vor.u32 %v489_v4, %v488_v63  ;;  %v1480_v63 = vld [vmem:[%s1242_s22 + $0x38] sm:$0xff]  }
  0x45   : > { %v1145_v7 = vunpack.c.l.b16 %v1480_v63 }
  0x46   : > { %v411_v23 = vshrl.u32 %v1428_v12, 16  ;;  %v525_v26 = vsel %vm1278_vm2, 0, %v491_v13  ;;  %v414_v33 = vshll.u32 %v1428_v12, 16 }
  0x47   : > { %659 = vrot.lane.b32.xlu2 %v522_v18, %s1193_s29  ;;  %v300_v18 = vrot.slane %v298_v5, 7 }
  0x4c   : > { %551 = vrot.lane.b32.xlu1 %v1370_v22, %s1189_s18  ;;  %549 = vrot.lane.b32.xlu0 %v1373_v24, %s1189_s18 }
  0x4f   : > { %581 = vrot.lane.b32.xlu2 %v427_v28, %s1190_s26  ;;  %v303_v28 = vor.u32 %v301_v14, %v300_v18 }
  0x51   : > { %v334_v36 = vsel %vm1278_vm2, 0, %v303_v28 }
  0x54   : > { %641 = vrot.lane.b32.xlu1 %v1294_v29, %s1192_s28  ;;  %583 = vrot.lane.b32.xlu0 %v428_v31, %s1190_s26  ;;  %v258_v29 = vld [vmem:[%s1248_s25 + $0x30] sm:$0xf]  ;;  %v413_v31 = vrot.slane %v411_v23, 7 }
  0x56   : > { %v416_v38 = vor.u32 %v414_v33, %v413_v31 }
  0x57   : > { %643 = vrot.lane.b32.xlu2 %v1302_v35, %s1192_s28  ;;  %v351_v35 = vunpack.c.l.b16 %v258_v29  ;;  %v270_v29 = vshrl.u32 %v1254_v2, 16 }
  0x58   : > { %v432_v3 = vsel %vm1278_vm2, 0, %v416_v38  ;;  %v1150_v38 = vunpack.c.h.b16 %v1410_v51 }
  0x59   : > { %v1416_v60 = vpack.c.b16 %v351_v35, %v351_v35  ;;  %v272_v50 = vrot.slane %v270_v29, 7  ;;  %v284_v29 = vshrl.u32 %v1343_v56, 16 }
  0x5a   : > { %v1519_v51 = vpack.c.b16 %v1150_v38, %v1150_v38  ;;  %v308_v38 = vshll.u32 %v1386_v32, 16 }
  0x5b   : > { %v404_v11 = vshrl.u32 %v1416_v60, 16  ;;  %v407_v21 = vshll.u32 %v1416_v60, 16  ;;  %v275_v61 = vor.u32 %v273_v47, %v272_v50  ;;  %v287_v50 = vshll.u32 %v1343_v56, 16 }
  0x5c   : > { %692 = vrot.lane.b32.xlu1 %v683_v39, %s1194_s30  ;;  %690 = vrot.lane.b32.xlu0 %v682_v41, %s1194_s30 }
  0x5d   : > { %v406_v20 = vrot.slane %v404_v11, 7  ;;  %v330_v24 = vsel %vm1278_vm2, 0, %v275_v61 }
  0x5f   : > { %565 = vrot.lane.b32.xlu2 %v1386_v32, %s1188_s17  ;;  %v409_v30 = vor.u32 %v407_v21, %v406_v20  ;;  %v616_v21 = vpack.c.b16 %v1145_v7, %v1145_v7 }
  0x61   : > { %v431_v37 = vsel %vm1278_vm2, 0, %v409_v30 }
  0x64   : > { %621 = vrot.lane.b32.xlu1 %v611_v54, %s1191_s27  ;;  %567 = vrot.lane.b32.xlu0 %v1420_v62, %s1188_s17  ;;  %s1123_s17 = sshll.u32 %s1722_s16, 3 }
  0x65   : > { %s228_s20 = scalar_lea.vmem %s1718_s4, %s1123_s17 }
  0x67   : > { %623 = vrot.lane.b32.xlu2 %v612_v6, %s1191_s27 }
  0x69   : > { %v546_v25 = vpop.permute.xlu2 %545 }
  0x6a   : > { %v737_v34 = vsel %vm722_vm3, %v333_v15, %v546_v25 }
  0x6c   : > { %667 = vrot.lane.b32.xlu1 %v526_v19, %s1193_s29  ;;  %665 = vrot.lane.b32.xlu0 %v525_v26, %s1193_s29 }
  0x6f   : > { %706 = vrot.lane.b32.xlu2 %v1328_v49, %s1195_s5  ;;  %v444_v49 = vunpack.c.l.b16 %v1291_v27  ;;  %v242_v27 = vld [vmem:[%s1242_s22 + $0x30] sm:$0xf] }
  0x70   : > { %v607_v58 = vunpack.c.l.b16 %v242_v27  ;;  %v676_v27 = vunpack.c.l.b16 %v1311_v40 }
  0x71   : > { %v548_v39 = vpop.permute.xlu2 %547  ;;  %v1465_v35 = vpack.c.b16 %v444_v49, %v444_v49 }
  0x72   : > { %v1451_v41 = vsel %vm722_vm3, %v334_v36, %v548_v39 }
  0x73   : > { %v479_v4 = vshrl.u32 %v1465_v35, 16 }
  0x74   : > { %589 = vrot.lane.b32.xlu1 %v431_v37, %s1190_s26  ;;  %708 = vrot.lane.b32.xlu0 %v1335_v52, %s1195_s5  ;;  %v1470_v52 = vpack.c.b16 %v443_v45, %v443_v45  ;;  %v277_v45 = vshrl.u32 %v1326_v48, 16 }
  0x75   : > { %v481_v11 = vrot.slane %v479_v4, 7 }
  0x76   : > { %v472_v6 = vshrl.u32 %v1470_v52, 16  ;;  %v475_v15 = vshll.u32 %v1470_v52, 16 }
  0x77   : > { %591 = vrot.lane.b32.xlu2 %v432_v3, %s1190_s26 }
  0x78   : > { %v474_v14 = vrot.slane %v472_v6, 7 }
  0x79   : > { %v562_v53 = vpop.permute.xlu2 %561 }
  0x7a   : > { %v757_v54 = vsel %vm747_vm4, %v737_v34, %v562_v53  ;;  %v477_v26 = vor.u32 %v475_v15, %v474_v14  ;;  %v447_v34 = vunpack.c.l.b16 %v1420_v62  ;;  %v280_v53 = vshll.u32 %v1326_v48, 16 }
  0x7b   : > { %v1146_v15 = vunpack.c.h.b16 %v1480_v63 }
  0x7c   : > { %639 = vrot.lane.b32.xlu1 %v1360_v16, %s1192_s28  ;;  %637 = vrot.lane.b32.xlu0 %v1354_v9, %s1192_s28  ;;  %v615_v16 = vpack.c.b16 %v607_v58, %v607_v58  ;;  %v482_v9 = vshll.u32 %v1465_v35, 16  ;;  %v523_v31 = vsel %vm1278_vm2, 0, %v477_v26  ;;  %v1503_v36 = vpack.c.b16 %v447_v34, %v447_v34 }
  0x7d   : > { %v312_v34 = vshrl.u32 %v1420_v62, 16 }
  0x7e   : > { %v554_v55 = vpop.permute.xlu1 %553  ;;  %v538_v10 = vpop.permute.xlu0 %537  ;;  %v484_v23 = vor.u32 %v482_v9, %v481_v11  ;;  %v500_v46 = vshrl.u32 %v1503_v36, 16 }
  0x7f   : > { %v725_v2 = vsel %vm722_vm3, %v329_v0, %v538_v10  ;;  %698 = vrot.lane.b32.xlu2 %v686_v57, %s1194_s30  ;;  %v677_v0 = vunpack.c.l.b16 %v1251_v1  ;;  %v503_v10 = vshll.u32 %v1503_v36, 16  ;;  %v507_v1 = vshrl.u32 %v1519_v51, 16 }
  0x80   : > { %v749_v5 = vsel %vm747_vm4, %v725_v2, %v554_v55  ;;  %v524_v28 = vsel %vm1278_vm2, 0, %v484_v23  ;;  %v502_v55 = vrot.slane %v500_v46, 7  ;;  %v689_v23 = vpack.c.b16 %v1146_v15, %v1146_v15 }
  0x81   : > { %v620_v13 = vpop.permute.xlu2 %619  ;;  %v685_v56 = vpack.c.b16 %v677_v0, %v677_v0  ;;  %v509_v4 = vrot.slane %v507_v1, 7 }
  0x82   : > { %v505_v59 = vor.u32 %v503_v10, %v502_v55 }
  0x84   : > { %629 = vrot.lane.b32.xlu1 %v615_v16, %s1191_s27  ;;  %700 = vrot.lane.b32.xlu0 %v687_v8, %s1194_s30 }
  0x86   : > { %v556_v18 = vpop.permute.xlu1 %555  ;;  %v540_v19 = vpop.permute.xlu0 %539 }
  0x87   : > { %v728_v20 = vsel %vm722_vm3, %v330_v24, %v540_v19  ;;  %631 = vrot.lane.b32.xlu2 %v616_v21, %s1191_s27 }
  0x88   : > { %v751_v25 = vsel %vm747_vm4, %v728_v20, %v556_v18  ;;  %v680_v18 = vunpack.c.l.b16 %v1370_v22 }
  0x89   : > { %v586_v30 = vpop.permute.xlu2 %585 }
  0x8a   : > { %v774_v33 = vsel %vm764_vm5, %v757_v54, %v586_v30  ;;  %v279_v54 = vrot.slane %v277_v45, 7  ;;  %v305_v30 = vshrl.u32 %v1386_v32, 16 }
  0x8c   : > { %663 = vrot.lane.b32.xlu1 %v524_v28, %s1193_s29  ;;  %661 = vrot.lane.b32.xlu0 %v523_v31, %s1193_s29  ;;  %v282_v58 = vor.u32 %v280_v53, %v279_v54 }
  0x8e   : > { %v580_v37 = vpop.permute.xlu1 %579  ;;  %v578_v42 = vpop.permute.xlu0 %577 }
  0x8f   : > { %v768_v39 = vsel %vm764_vm5, %v751_v25, %v580_v37  ;;  %v766_v49 = vsel %vm764_vm5, %v749_v5, %v578_v42  ;;  %714 = vrot.lane.b32.xlu2 %v1400_v44, %s1195_s5  ;;  %v286_v44 = vrot.slane %v284_v29, 7  ;;  %v510_v5 = vshll.u32 %v1519_v51, 16 }
  0x90   : > { %v1513_v3 = vsel %vm781_vm6, %v768_v39, %v620_v13  ;;  %v688_v25 = vpack.c.b16 %v680_v18, %v680_v18  ;;  %v314_v37 = vrot.slane %v312_v34, 7  ;;  %v307_v39 = vrot.slane %v305_v30, 7 }
  0x91   : > { %v1517_v47 = vpop.permute.xlu2 %635  ;;  %v289_v48 = vor.u32 %v287_v50, %v286_v44  ;;  %v512_v8 = vor.u32 %v510_v5, %v509_v4 }
  0x92   : > { %v310_v45 = vor.u32 %v308_v38, %v307_v39  ;;  %v802_v15 = vsel %vm798_vm8, %v1513_v3, %v1517_v47 }
  0x93   : > { %v332_v16 = vsel %vm1278_vm2, 0, %v289_v48  ;;  %v528_v14 = vsel %vm1278_vm2, 0, %v512_v8 }
  0x94   : > { %645 = vrot.lane.b32.xlu1 %v1416_v60, %s1192_s28  ;;  %716 = vrot.lane.b32.xlu0 %v1397_v43, %s1195_s5  ;;  %v684_v43 = vpack.c.b16 %v676_v27, %v676_v27  ;;  %v335_v32 = vsel %vm1278_vm2, 0, %v310_v45 }
  0x96   : > { %v618_v57 = vpop.permute.xlu1 %617  ;;  %v564_v2 = vpop.permute.xlu0 %563 }
  0x97   : > { %v1532_v40 = vsel %vm781_vm6, %v766_v49, %v618_v57  ;;  %v759_v60 = vsel %vm747_vm4, %v1451_v41, %v564_v2  ;;  %647 = vrot.lane.b32.xlu2 %v1428_v12, %s1192_s28  ;;  %v331_v12 = vsel %vm1278_vm2, 0, %v282_v58  ;;  %v527_v41 = vsel %vm1278_vm2, 0, %v505_v59 }
  0x99   : > { %v626_v61 = vpop.permute.xlu2 %625 }
  0x9a   : > { %v1540_v6 = vsel %vm781_vm6, %v774_v33, %v626_v61  ;;  %v315_v33 = vshll.u32 %v1420_v62, 16  ;;  %v870_v62 = vld [vmem:[%s1716_s2 + $0x10] sm:$0x3] }
  0x9c   : > { %696 = vrot.lane.b32.xlu1 %v685_v56, %s1194_s30  ;;  %694 = vrot.lane.b32.xlu0 %v684_v43, %s1194_s30  ;;  %v317_v49 = vor.u32 %v315_v33, %v314_v37 }
  0x9e   : > { %v544_v7 = vpop.permute.xlu1 %543  ;;  %v542_v24 = vpop.permute.xlu0 %541  ;;  %v336_v0 = vsel %vm1278_vm2, 0, %v317_v49 }
  0x9f   : > { %v734_v11 = vsel %vm722_vm3, %v332_v16, %v544_v7  ;;  %v731_v9 = vsel %vm722_vm3, %v331_v12, %v542_v24  ;;  %669 = vrot.lane.b32.xlu2 %v527_v41, %s1193_s29 }
  0xa1   : > { %v1553_v13 = vpop.permute.xlu2 %659 }
  0xa2   : > { %v819_v18 = vsel %vm815_vm10, %v802_v15, %v1553_v13 }
  0xa4   : > { %710 = vrot.lane.b32.xlu1 %v1470_v52, %s1195_s5  ;;  %671 = vrot.lane.b32.xlu0 %v528_v14, %s1193_s29 }
  0xa6   : > { %v1562_v19 = vpop.permute.xlu1 %633  ;;  %v588_v20 = vpop.permute.xlu0 %587 }
  0xa7   : > { %v776_v21 = vsel %vm764_vm5, %v759_v60, %v588_v20  ;;  %712 = vrot.lane.b32.xlu2 %v1465_v35, %s1195_s5  ;;  %v1141_v60 = vld [vmem:[%s1716_s2] sm:$0xff]  ;;  %v800_v8 = vsel %vm798_vm8, %v1532_v40, %v1562_v19 }
  0xa9   : > { %v582_v26 = vpop.permute.xlu2 %581 }
  0xac   : > { %704 = vrot.lane.b32.xlu1 %v689_v23, %s1194_s30  ;;  %702 = vrot.lane.b32.xlu0 %v688_v25, %s1194_s30 }
  0xae   : > { %v560_v52 = vpop.permute.xlu1 %559  ;;  %v558_v63 = vpop.permute.xlu0 %557 }
  0xaf   : > { %v755_v22 = vsel %vm747_vm4, %v734_v11, %v560_v52  ;;  %v753_v28 = vsel %vm747_vm4, %v731_v9, %v558_v63  ;;  %718 = vrot.lane.b32.xlu2 %v1503_v36, %s1195_s5 }
  0xb0   : > { %v1576_v35 = vsel %vm764_vm5, %v753_v28, %v582_v26 }
  0xb1   : > { %v1578_v31 = vpop.permute.xlu2 %643 }
  0xb4   : > { %720 = vrot.lane.b32.xlu0 %v1519_v51, %s1195_s5  ;;  %v900_v51 = vunpack.c.l.b16 %v870_v62 }
  0xb6   : > { %v658_v42 = vpop.permute.xlu1 %657  ;;  %v628_v29 = vpop.permute.xlu0 %627  ;;  %v903_v53 = vpack.c.b16 %v900_v51, %v900_v51 }
  0xb7   : > { %v1585_v36 = vsel %vm781_vm6, %v776_v21, %v628_v29  ;;  %v817_v24 = vsel %vm815_vm10, %v800_v8, %v658_v42 }
  0xb8   : > { %v921_v55 = vsel %vm919_vm7, %v903_v53, 0  ;;  %v810_v29 = vsel %vm798_vm8, %v1585_v36, %v1578_v31 }
  0xb9   : > { %v566_v46 = vpop.permute.xlu2 %565  ;;  %928 = vmatpush.bf16.msra.mxu0 %v921_v55  ;;  %1154 = vmatpush.bf16.msra.mxu2 %v921_v55 }
  0xba   : > { %1153 = vmatpush.bf16.msra.mxu1 %v921_v55  ;;  %1155 = vmatpush.bf16.msra.mxu3 %v921_v55 }
  0xbd   : > { %929 = vmatpush.bf16.msra.mxu0 %v1142_v17  ;;  %1157 = vmatpush.bf16.msra.mxu2 %v1142_v17 }
  0xbe   : > { %v552_v27 = vpop.permute.xlu1 %551  ;;  %v550_v50 = vpop.permute.xlu0 %549  ;;  %1156 = vmatpush.bf16.msra.mxu1 %v1142_v17  ;;  %1158 = vmatpush.bf16.msra.mxu3 %v1142_v17 }
  0xbf   : > { %v746_v44 = vsel %vm722_vm3, %v336_v0, %v552_v27  ;;  %v743_v54 = vsel %vm722_vm3, %v335_v32, %v550_v50 }
  0xc0   : > { %v761_v10 = vsel %vm747_vm4, %v743_v54, %v566_v46 }
  0xc1   : > { %v1598_v57 = vpop.permute.xlu2 %623  ;;  %930 = vmatpush.bf16.msra.mxu0 %v1141_v60  ;;  %1160 = vmatpush.bf16.msra.mxu2 %v1141_v60 }
  0xc2   : > { %1159 = vmatpush.bf16.msra.mxu1 %v1141_v60  ;;  %1161 = vmatpush.bf16.msra.mxu3 %v1141_v60 }
  0xc6   : > { %v642_v1 = vpop.permute.xlu1 %641  ;;  %v584_v2 = vpop.permute.xlu0 %583 }
  0xc7   : > { %v1604_v56 = vsel %vm764_vm5, %v755_v22, %v584_v2  ;;  %v808_v39 = vsel %vm798_vm8, %v1540_v6, %v642_v1 }
  0xc8   : > { %v789_v54 = vsel %vm781_vm6, %v1604_v56, %v1598_v57 }
  0xc9   : > { %v707_v48 = vpop.permute.xlu2 %706 }
  0xce   : > { %v693_v43 = vpop.permute.xlu1 %692  ;;  %v691_v58 = vpop.permute.xlu0 %690 }
  0xcf   : > { %v834_v9 = vsel %vm832_vm9, %v817_v24, %v691_v58  ;;  %v836_v40 = vsel %vm832_vm9, %v819_v18, %v693_v43 }
  0xd0   : > { %v851_v20 = vsel %vm849_vm11, %v834_v9, %v707_v48 }
  0xd1   : > { %v592_v59 = vpop.permute.xlu2 %591  ;;  %v879_v26 = vunpack.c.l.b16 %v851_v20 }
  0xd6   : > { %v1609_v61 = vpop.permute.xlu1 %621  ;;  %v568_v4 = vpop.permute.xlu0 %567 }
  0xd7   : > { %v763_v5 = vsel %vm747_vm4, %v746_v44, %v568_v4  ;;  %v787_v60 = vsel %vm781_vm6, %v1576_v35, %v1609_v61 }
  0xd8   : > { %v780_v16 = vsel %vm764_vm5, %v763_v5, %v592_v59 }
  0xd9   : > { %v699_v12 = vpop.permute.xlu2 %698 }
  0xde   : > { %v668_v41 = vpop.permute.xlu1 %667  ;;  %v666_v7 = vpop.permute.xlu0 %665 }
  0xdf   : > { %v825_v42 = vsel %vm815_vm10, %v808_v39, %v666_v7  ;;  %v827_v46 = vsel %vm815_vm10, %v810_v29, %v668_v41 }
  0xe0   : > { %v842_v49 = vsel %vm832_vm9, %v825_v42, %v699_v12 }
  0xe1   : > { %v632_v11 = vpop.permute.xlu2 %631 }
  0xe2   : > { %v797_v14 = vsel %vm781_vm6, %v780_v16, %v632_v11 }
  0xe6   : > { %v590_v21 = vpop.permute.xlu1 %589  ;;  %v709_v19 = vpop.permute.xlu0 %708 }
  0xe7   : > { %v778_v23 = vsel %vm764_vm5, %v761_v10, %v590_v21  ;;  %v853_v25 = vsel %vm849_vm11, %v836_v40, %v709_v19 }
  0xe8   : > { %v880_v52 = vunpack.c.l.b16 %v853_v25 }
  0xe9   : > { %v715_v63 = vpop.permute.xlu2 %714 }
  0xea   : > { %v887_v22 = vpack.c.b16 %v880_v52, %v879_v26  ;;  %v859_v0 = vsel %vm849_vm11, %v842_v49, %v715_v63 }
  0xeb   : > { %v883_v44 = vunpack.c.l.b16 %v859_v0 }
  0xec   : > { %1132 = vmatmul.msk.bf16.vlgmr.msra.gmra.mxu0 %vm906_vm12, %v887_v22 }
  0xee   : > { %v640_v3 = vpop.permute.xlu1 %639  ;;  %v638_v47 = vpop.permute.xlu0 %637 }
  0xef   : > { %v806_v10 = vsel %vm798_vm8, %v789_v54, %v640_v3  ;;  %v804_v48 = vsel %vm798_vm8, %v787_v60, %v638_v47 }
  0xf1   : > { %v648_v13 = vpop.permute.xlu2 %647 }
  0xf2   : > { %v814_v34 = vsel %vm798_vm8, %v797_v14, %v648_v13 }
  0xf6   : > { %v630_v28 = vpop.permute.xlu1 %629  ;;  %v701_v30 = vpop.permute.xlu0 %700 }
  0xf7   : > { %v795_v33 = vsel %vm781_vm6, %v778_v23, %v630_v28  ;;  %v844_v32 = vsel %vm832_vm9, %v827_v46, %v701_v30 }
  0xf9   : > { %v670_v45 = vpop.permute.xlu2 %669 }
  0xfe   : > { %v664_v37 = vpop.permute.xlu1 %663  ;;  %v662_v38 = vpop.permute.xlu0 %661 }
  0xff   : > { %v823_v17 = vsel %vm815_vm10, %v806_v10, %v664_v37  ;;  %v821_v43 = vsel %vm815_vm10, %v804_v48, %v662_v38 }
 0x101   : > { %v713_v2 = vpop.permute.xlu2 %712 }
 0x106   : > { %v646_v62 = vpop.permute.xlu1 %645  ;;  %v717_v51 = vpop.permute.xlu0 %716 }
 0x107   : > { %v812_v27 = vsel %vm798_vm8, %v795_v33, %v646_v62  ;;  %v861_v6 = vsel %vm849_vm11, %v844_v32, %v717_v51 }
 0x108   : > { %v829_v50 = vsel %vm815_vm10, %v812_v27, %v670_v45  ;;  %v884_v53 = vunpack.c.l.b16 %v861_v6 }
 0x109   : > { %v719_v61 = vpop.permute.xlu2 %718 }
 0x10a   : > { %v889_v31 = vpack.c.b16 %v884_v53, %v883_v44 }
 0x10c   : > { %1134 = vmatmul.msk.bf16.vlgmr.msra.gmra.mxu2 %vm906_vm12, %v889_v31 }
 0x10e   : > { %v697_v36 = vpop.permute.xlu1 %696  ;;  %v695_v55 = vpop.permute.xlu0 %694 }
 0x10f   : > { %v840_v1 = vsel %vm832_vm9, %v823_v17, %v697_v36  ;;  %v838_v57 = vsel %vm832_vm9, %v821_v43, %v695_v55 }
 0x110   : > { %v857_v58 = vsel %vm849_vm11, %v840_v1, %v713_v2 }
 0x111   : > { %v882_v5 = vunpack.c.l.b16 %v857_v58 }
 0x116   : > { %v711_v56 = vpop.permute.xlu1 %710  ;;  %v672_v59 = vpop.permute.xlu0 %671 }
 0x117   : > { %v855_v4 = vsel %vm849_vm11, %v838_v57, %v711_v56  ;;  %v831_v16 = vsel %vm815_vm10, %v814_v34, %v672_v59 }
 0x118   : > { %v881_v12 = vunpack.c.l.b16 %v855_v4 }
 0x11a   : > { %v888_v41 = vpack.c.b16 %v882_v5, %v881_v12 }
 0x11c   : > { %1133 = vmatmul.msk.bf16.vlgmr.msra.gmra.mxu1 %vm906_vm12, %v888_v41 }
 0x11e   : > { %v705_v35 = vpop.permute.xlu1 %704  ;;  %v703_v7 = vpop.permute.xlu0 %702 }
 0x11f   : > { %v848_v8 = vsel %vm832_vm9, %v831_v16, %v705_v35  ;;  %v846_v24 = vsel %vm832_vm9, %v829_v50, %v703_v7 }
 0x120   : > { %v863_v11 = vsel %vm849_vm11, %v846_v24, %v719_v61 }
 0x121   : > { %v885_v15 = vunpack.c.l.b16 %v863_v11 }
 0x126   : > { %v721_v9 = vpop.permute.xlu0 %720 }
 0x127   : > { %v865_v14 = vsel %vm849_vm11, %v848_v8, %v721_v9 }
 0x128   : > { %v886_v18 = vunpack.c.l.b16 %v865_v14 }
 0x12a   : > { %v890_v20 = vpack.c.b16 %v886_v18, %v885_v15 }
 0x12c   : > { %1135 = vmatmul.msk.bf16.vlgmr.msra.gmra.mxu3 %vm906_vm12, %v890_v20 }
 0x169   : > { %v932_v21 = vpop.f32.mrf.mxu0 }
 0x16a   : > { %952 = vst.msk [vmem:[%s1670_s14] sm:$0xff] %vm747_vm4, %v932_v21  ;;  %v981_v63 = vmul.f32 %v932_v21, %v932_v21  ;;  %v960_v47 = vsel %vm747_vm4, %v932_v21, 0.0 }
 0x16c   : > { %v989_v33 = vsel %vm747_vm4, %v981_v63, 0.0 }
 0x171   : > { %v934_v40 = vpop.f32.mrf.mxu0 }
 0x172   : > { %953 = vst.msk [vmem:[%s1670_s14 + $0x8] sm:$0xff] %vm747_vm4, %v934_v40  ;;  %v982_v52 = vmul.f32 %v934_v40, %v934_v40  ;;  %v961_v22 = vsel %vm747_vm4, %v934_v40, 0.0 }
 0x173   : > { %v962_v30 = vadd.f32 %v961_v22, %v960_v47 }
 0x174   : > { %v990_v13 = vsel %vm747_vm4, %v982_v52, 0.0 }
 0x175   : > { %v991_v39 = vadd.f32 %v990_v13, %v989_v33 }
 0x18f   : > { %v942_v19 = vpop.f32.mrf.mxu2 }
 0x190   : > { %956 = vst.msk [vmem:[%s1670_s14 + $0x20] sm:$0xff] %vm747_vm4, %v942_v19  ;;  %v985_v46 = vmul.f32 %v942_v19, %v942_v19  ;;  %v967_v32 = vsel %vm747_vm4, %v942_v19, 0.0 }
 0x192   : > { %v996_v27 = vsel %vm747_vm4, %v985_v46, 0.0 }
 0x197   : > { %v944_v23 = vpop.f32.mrf.mxu2 }
 0x198   : > { %957 = vst.msk [vmem:[%s1670_s14 + $0x28] sm:$0xff] %vm747_vm4, %v944_v23  ;;  %v986_v6 = vmul.f32 %v944_v23, %v944_v23  ;;  %v969_v53 = vsel %vm747_vm4, %v944_v23, 0.0 }
 0x199   : > { %v937_v25 = vpop.f32.mrf.mxu1 }
 0x19a   : > { %954 = vst.msk [vmem:[%s1670_s14 + $0x10] sm:$0xff] %vm747_vm4, %v937_v25  ;;  %v983_v3 = vmul.f32 %v937_v25, %v937_v25  ;;  %v963_v34 = vsel %vm747_vm4, %v937_v25, 0.0  ;;  %v998_v54 = vsel %vm747_vm4, %v986_v6, 0.0 }
 0x19b   : > { %v964_v42 = vadd.f32 %v963_v34, %v962_v30 }
 0x19c   : > { %v992_v37 = vsel %vm747_vm4, %v983_v3, 0.0 }
 0x19d   : > { %v993_v49 = vadd.f32 %v992_v37, %v991_v39 }
 0x1a1   : > { %v939_v26 = vpop.f32.mrf.mxu1 }
 0x1a2   : > { %955 = vst.msk [vmem:[%s1670_s14 + $0x18] sm:$0xff] %vm747_vm4, %v939_v26  ;;  %v984_v28 = vmul.f32 %v939_v26, %v939_v26  ;;  %v965_v38 = vsel %vm747_vm4, %v939_v26, 0.0 }
 0x1a3   : > { %v966_v45 = vadd.f32 %v965_v38, %v964_v42 }
 0x1a4   : > { %v994_v29 = vsel %vm747_vm4, %v984_v28, 0.0 }
 0x1a5   : > { %v995_v0 = vadd.f32 %v994_v29, %v993_v49  ;;  %v968_v51 = vadd.f32 %v967_v32, %v966_v45 }
 0x1a7   : > { %v997_v44 = vadd.f32 %v996_v27, %v995_v0  ;;  %v970_v36 = vadd.f32 %v969_v53, %v968_v51 }
 0x1a9   : > { %v999_v17 = vadd.f32 %v998_v54, %v997_v44 }
 0x1af   : > { %v947_v62 = vpop.f32.mrf.mxu3 }
 0x1b0   : > { %958 = vst.msk [vmem:[%s1670_s14 + $0x30] sm:$0xff] %vm747_vm4, %v947_v62  ;;  %v987_v50 = vmul.f32 %v947_v62, %v947_v62  ;;  %v971_v31 = vsel %vm747_vm4, %v947_v62, 0.0 }
 0x1b1   : > { %v972_v10 = vadd.f32 %v971_v31, %v970_v36 }
 0x1b2   : > { %v1000_v55 = vsel %vm747_vm4, %v987_v50, 0.0 }
 0x1b3   : > { %v1001_v48 = vadd.f32 %v1000_v55, %v999_v17 }
 0x1b7   : > { %v949_v1 = vpop.f32.mrf.mxu3 }
 0x1b8   : > { %959 = vst.msk [vmem:[%s1670_s14 + $0x38] sm:$0xff] %vm747_vm4, %v949_v1  ;;  %v973_v2 = vsel %vm747_vm4, %v949_v1, 0.0  ;;  %v988_v60 = vmul.f32 %v949_v1, %v949_v1 }
 0x1b9   : > { %v974_v43 = vadd.f32 %v973_v2, %v972_v10 }
 0x1ba   : > { %v1002_v58 = vsel %vm747_vm4, %v988_v60, 0.0 }
 0x1bb   : > { %v975_v57 = vrot.slane %v974_v43, 4  ;;  %v1003_v56 = vadd.f32 %v1002_v58, %v1001_v48 }
 0x1bd   : > { %v976_v59 = vadd.f32 %v975_v57, %v974_v43  ;;  %v1004_v4 = vrot.slane %v1003_v56, 4 }
 0x1bf   : > { %v977_v5 = vrot.slane %v976_v59, 2  ;;  %v1005_v16 = vadd.f32 %v1004_v4, %v1003_v56 }
 0x1c1   : > { %v978_v12 = vadd.f32 %v977_v5, %v976_v59  ;;  %v1006_v41 = vrot.slane %v1005_v16, 2 }
 0x1c3   : > { %v979_v35 = vrot.slane %v978_v12, 1  ;;  %v1007_v61 = vadd.f32 %v1006_v41, %v1005_v16 }
 0x1c5   : > { %v1008_v7 = vrot.slane %v1007_v61, 1  ;;  %v980_v8 = vadd.f32 %v979_v35, %v978_v12 }
 0x1c7   : > { %v1009_v24 = vadd.f32 %v1008_v7, %v1007_v61 }
 0x1c9   : > { %v1011_v11 = vsel %vm326_vm0, %v980_v8, %v1009_v24 }
 0x1ca   : > { %v1012_v9 = vsel %vm919_vm7, %v1011_v11, 0.0 }
 0x1cb   : > { %1013 = vst.msk [vmem:[%s228_s20] sm:$0xff] %vm747_vm4, %v1012_v9 }
 0x1cc PF: > { %s15_s15 = sadd.s32 1, %s1185_s15  }
 0x1cd   : > { %p12_p4 = scmp.ge.s32.totalorder %s15_s15, 4  }
 0x1cf   :  { %14 = sbr.rel (!%p12_p4) target bundleno = 1 (0x1), region = 77 }

// kernel: basic_block_forward.5
= control target key start
LH: loop header
LB: loop body
LE: loop exit
PB: predicated region body
PF: predicated region fallthrough
CT: control target
= control target key end

     0   :  { %s1168_s15 = smov 0   ;;  %s1728_s0 = inlined_call_operand.vmem [shape: f32[2,8,8,8], index: 0, kind: input, shape index: {}]   ;;  %s1729_s1 = inlined_call_operand.vmem [shape: bf16[72,8], index: 1, kind: input, shape index: {}]   ;;  %s1730_s2 = inlined_call_operand.vmem [shape: f32[2,8], index: 2, kind: input, shape index: {}]   ;;  %s1731_s3 = inlined_call_operand.vmem [shape: f32[2,8,8,8], index: 3, kind: output, shape index: {0}]   ;;  %s1732_s4 = inlined_call_operand.vmem [shape: f32[2,8,8], index: 4, kind: output, shape index: {1}]  }
   0x1 LB: > { %s1056_s16 = sadd.s32 4294967295, %s1132_s15   ;;  %p1060_p0 = scmp.ge.s32.totalorder %s1132_s15, 1  ;;  %s1132_s15 = sphi %s1168_s15, %s15_s15  }
   0x2   : > { %p165_p1 = scmp.lt.s32.totalorder %s1132_s15, 3 }
   0x4   : > { %p166_p2 = pnand %p1060_p0, %p165_p1 }
   0x5   : > { %s1135_s17 = smov (!%p166_p2), 8   ;;  %p195_p3 = scmp.lt.s32.totalorder (!%p166_p2), %s1056_s16, 1 }
   0x6   : > { %169 = sbr.rel (%p166_p2) target bundleno = 464 (0x1d0), region = 32  ;;  %s1136_s20 = smov (!%p166_p2), 16  }
   0x7   : > { %s1137_s25 = smov (!%p166_p2), 32   ;;  %s1138_s26 = smov (!%p166_p2), 24  }
   0x8   : > { %s1139_s27 = smov (!%p166_p2), 40   ;;  %s1140_s28 = smov (!%p166_p2), 48  }
   0x9   : > { %s1141_s29 = smov (!%p166_p2), 56   ;;  %s1142_s30 = smov (!%p166_p2), 64  }
   0xb   : > { %vm352_vm0 = vcmask 1043456   ;;  %vm353_vm1 = vsmask.f32 3328  ;;  %v1134_v0 = vmov 0   ;;  %v210_v3 = vld [vmem:[%s1730_s2] sm:$0x3] }
   0xc   : > { %507 = vrot.lane.b32.xlu0 %v1134_v0, %s1135_s17  ;;  %v328_v1 = vrot.slane %v1134_v0, 1  ;;  %vm1180_vm2 = vmand %vm352_vm0, %vm353_vm1  ;;  %s1738_s16 = smov (!%p195_p3, %s1056_s16), 1  ;;  %v1192_v5 = vperm.slane %v210_v3, 0  ;;  %v1202_v6 = vperm.slane %v210_v3, 1  ;;  %vm317_vm3 = vcmask 1040384  }
   0xd   : > { %s1088_s21 = sshll.u32 %s1738_s16, 6  ;;  %vm318_vm4 = vsmask.f32 256  ;;  %vm661_vm6 = vcmask 64512   ;;  %vm686_vm7 = vcmask 130048   ;;  %vm703_vm8 = vcmask 195584  }
   0xe   : > { %v355_v4 = vsel %vm1180_vm2, %v328_v1, 0  ;;  %s1200_s24 = scalar_lea.vmem %s1728_s0, %s1088_s21  ;;  %vm1269_vm5 = vmand %vm317_vm3, %vm318_vm4  ;;  %vm720_vm9 = vcmask 261120   ;;  %vm737_vm10 = vcmask 326656   ;;  %vm771_vm11 = vcmask 457728   ;;  %s1685_s19 = scalar_lea.vmem %s1731_s3, %s1088_s21 }
   0xf   : > { %531 = vrot.lane.b32.xlu1 %v355_v4, %s1136_s20  ;;  %v214_v7 = vld [vmem:[%s1200_s24 + $0x18] sm:$0xff]  ;;  %v211_v8 = vld [vmem:[%s1200_s24] sm:$0xff]  ;;  %v212_v13 = vld [vmem:[%s1200_s24 + $0x8] sm:$0xff]  ;;  %vm754_vm12 = vcmask 392192   ;;  %vm788_vm13 = vcmask 523264   ;;  %vm861_vm14 = vcmask 588800  }
  0x10   : > { %v215_v9 = vld [vmem:[%s1200_s24 + $0x20] sm:$0xff]  ;;  %v223_v10 = vmul.f32 %v1192_v5, %v214_v7  ;;  %v220_v11 = vmul.f32 %v1192_v5, %v211_v8  ;;  %v216_v14 = vld [vmem:[%s1200_s24 + $0x28] sm:$0xff]  ;;  %v221_v15 = vmul.f32 %v1192_v5, %v212_v13  ;;  %v213_v58 = vld [vmem:[%s1200_s24 + $0x10] sm:$0xff]  ;;  %vm967_vm15 = vcmask 1041408  }
  0x11   : > { %v224_v12 = vmul.f32 %v1192_v5, %v215_v9  ;;  %v225_v16 = vmul.f32 %v1192_v5, %v216_v14  ;;  %v222_v61 = vmul.f32 %v1192_v5, %v213_v58 }
  0x12   : > { %v232_v17 = vadd.f32 %v1202_v6, %v223_v10  ;;  %v229_v18 = vadd.f32 %v1202_v6, %v220_v11  ;;  %v230_v20 = vadd.f32 %v1202_v6, %v221_v15 }
  0x13   : > { %v233_v19 = vadd.f32 %v1202_v6, %v224_v12  ;;  %v234_v24 = vadd.f32 %v1202_v6, %v225_v16  ;;  %v231_v7 = vadd.f32 %v1202_v6, %v222_v61 }
  0x14   : > { %v240_v21 = vmax.f32 %v232_v17, 0.0  ;;  %v237_v22 = vmax.f32 %v229_v18, 0.0  ;;  %v238_v25 = vmax.f32 %v230_v20, 0.0 }
  0x15   : > { %v241_v23 = vmax.f32 %v233_v19, 0.0  ;;  %v242_v33 = vmax.f32 %v234_v24, 0.0  ;;  %v239_v11 = vmax.f32 %v231_v7, 0.0 }
  0x16   : > { %v1219_v26 = vpack.c.bf16 %v240_v21, %v240_v21  ;;  %v1221_v27 = vpack.c.bf16 %v237_v22, %v237_v22  ;;  %v1225_v29 = vpack.c.bf16 %v238_v25, %v238_v25 }
  0x17   : > { %v1223_v28 = vpack.c.bf16 %v241_v23, %v241_v23  ;;  %v1253_v49 = vpack.c.bf16 %v242_v33, %v242_v33  ;;  %v1301_v16 = vpack.c.bf16 %v239_v11, %v239_v11 }
  0x18   : > { %515 = vrot.lane.b32.xlu2 %v1219_v26, %s1135_s17  ;;  %509 = vrot.lane.b32.xlu0 %v1221_v27, %s1135_s17  ;;  %v371_v30 = vunpack.c.l.b16 %v1221_v27  ;;  %v261_v34 = vshrl.u32 %v1221_v27, 16  ;;  %v264_v35 = vshll.u32 %v1221_v27, 16  ;;  %v285_v36 = vshll.u32 %v1219_v26, 16 }
  0x19   : > { %v289_v31 = vshrl.u32 %v1223_v28, 16  ;;  %v292_v32 = vshll.u32 %v1223_v28, 16  ;;  %v372_v37 = vunpack.c.l.b16 %v1225_v29  ;;  %v282_v43 = vshrl.u32 %v1219_v26, 16 }
  0x1a   : > { %v379_v38 = vpack.c.b16 %v371_v30, %v371_v30  ;;  %v330_v40 = vrot.slane %v264_v35, 1  ;;  %v336_v44 = vrot.slane %v285_v36, 1  ;;  %v375_v54 = vunpack.c.l.b16 %v1223_v28 }
  0x1b   : > { %v338_v39 = vrot.slane %v292_v32, 1  ;;  %v1242_v41 = vpack.c.b16 %v372_v37, %v372_v37  ;;  %v376_v59 = vunpack.c.l.b16 %v1253_v49  ;;  %v271_v20 = vshll.u32 %v1225_v29, 16 }
  0x1c   : > { %571 = vrot.lane.b32.xlu1 %v379_v38, %s1137_s25  ;;  %v388_v45 = vshrl.u32 %v379_v38, 16  ;;  %v331_v46 = vor.u32 %v330_v40, %v261_v34  ;;  %v391_v47 = vshll.u32 %v379_v38, 16  ;;  %v337_v52 = vor.u32 %v336_v44, %v282_v43 }
  0x1d   : > { %v339_v42 = vor.u32 %v338_v39, %v289_v31  ;;  %v395_v48 = vshrl.u32 %v1242_v41, 16  ;;  %v398_v53 = vshll.u32 %v1242_v41, 16  ;;  %v1275_v62 = vpack.c.b16 %v375_v54, %v375_v54 }
  0x1e   : > { %v390_v51 = vrot.slane %v388_v45, 7  ;;  %v356_v55 = vsel %vm1180_vm2, %v331_v46, 0  ;;  %v359_v63 = vsel %vm1180_vm2, %v337_v52, 0  ;;  %v1281_v4 = vpack.c.b16 %v376_v59, %v376_v59  ;;  %v217_v52 = vld [vmem:[%s1200_s24 + $0x30] sm:$0xff] }
  0x1f   : > { %v360_v50 = vsel %vm1180_vm2, %v339_v42, 0  ;;  %v397_v57 = vrot.slane %v395_v48, 7  ;;  %v416_v9 = vshrl.u32 %v1275_v62, 16  ;;  %v419_v13 = vshll.u32 %v1275_v62, 16 }
  0x20   : > { %517 = vrot.lane.b32.xlu2 %v1223_v28, %s1135_s17  ;;  %541 = vrot.lane.b32.xlu0 %v360_v50, %s1136_s20  ;;  %v393_v56 = vor.u32 %v391_v47, %v390_v51  ;;  %v423_v10 = vshrl.u32 %v1281_v4, 16  ;;  %v426_v15 = vshll.u32 %v1281_v4, 16  ;;  %v459_v17 = vrot.slane %v391_v47, 1 }
  0x21   : > { %v400_v3 = vor.u32 %v398_v53, %v397_v57  ;;  %v418_v12 = vrot.slane %v416_v9, 7  ;;  %v461_v22 = vrot.slane %v398_v53, 1  ;;  %v268_v23 = vshrl.u32 %v1225_v29, 16 }
  0x22   : > { %v451_v1 = vsel %vm1269_vm5, 0, %v393_v56  ;;  %v425_v14 = vrot.slane %v423_v10, 7  ;;  %v460_v21 = vor.u32 %v459_v17, %v388_v45  ;;  %v332_v30 = vrot.slane %v271_v20, 1 }
  0x23   : > { %v452_v8 = vsel %vm1269_vm5, 0, %v400_v3  ;;  %v421_v18 = vor.u32 %v419_v13, %v418_v12  ;;  %v278_v33 = vshll.u32 %v1301_v16, 16  ;;  %v462_v38 = vor.u32 %v461_v22, %v395_v48 }
  0x24   : > { %533 = vrot.lane.b32.xlu1 %v356_v55, %s1136_s20  ;;  %v428_v19 = vor.u32 %v426_v15, %v425_v14  ;;  %v483_v37 = vsel %vm1180_vm2, %v460_v21, 0  ;;  %v333_v39 = vor.u32 %v332_v30, %v268_v23  ;;  %v275_v40 = vshrl.u32 %v1301_v16, 16 }
  0x25   : > { %v1311_v24 = vsel %vm1269_vm5, 0, %v421_v18  ;;  %v334_v42 = vrot.slane %v278_v33, 1  ;;  %v373_v44 = vunpack.c.l.b16 %v1301_v16  ;;  %v1335_v45 = vsel %vm1180_vm2, %v462_v38, 0 }
  0x26   : > { %v1315_v25 = vsel %vm1269_vm5, 0, %v428_v19  ;;  %v357_v46 = vsel %vm1180_vm2, %v333_v39, 0  ;;  %v374_v53 = vunpack.c.l.b16 %v1219_v26  ;;  %v226_v54 = vmul.f32 %v1192_v5, %v217_v52 }
  0x27   : > { %v335_v47 = vor.u32 %v334_v42, %v275_v40  ;;  %v1341_v48 = vpack.c.b16 %v373_v44, %v373_v44  ;;  %v284_v14 = vrot.slane %v282_v43, 7  ;;  %v467_v19 = vrot.slane %v419_v13, 1 }
  0x28   : > { %539 = vrot.lane.b32.xlu2 %v359_v63, %s1136_s20  ;;  %555 = vrot.lane.b32.xlu0 %v451_v1, %s1138_s26  ;;  %v1356_v57 = vpack.c.b16 %v374_v53, %v374_v53  ;;  %v235_v58 = vadd.f32 %v1202_v6, %v226_v54  ;;  %v218_v1 = vld [vmem:[%s1200_s24 + $0x38] sm:$0xff]  ;;  %v299_v13 = vshll.u32 %v1253_v49, 16  ;;  %v492_v27 = vunpack.c.l.b16 %v1134_v0 }
  0x29   : > { %v358_v50 = vsel %vm1180_vm2, %v335_v47, 0  ;;  %v402_v51 = vshrl.u32 %v1341_v48, 16  ;;  %v405_v56 = vshll.u32 %v1341_v48, 16  ;;  %v227_v12 = vmul.f32 %v1192_v5, %v218_v1 }
  0x2a   : > { %v409_v61 = vshrl.u32 %v1356_v57, 16  ;;  %v243_v63 = vmax.f32 %v235_v58, 0.0  ;;  %v412_v11 = vshll.u32 %v1356_v57, 16  ;;  %v287_v21 = vor.u32 %v285_v36, %v284_v14 }
  0x2b   : > { %v404_v55 = vrot.slane %v402_v51, 7  ;;  %v236_v17 = vadd.f32 %v1202_v6, %v227_v12  ;;  %v291_v5 = vrot.slane %v289_v31, 7  ;;  %v469_v6 = vrot.slane %v426_v15, 1 }
  0x2c   : > { %557 = vrot.lane.b32.xlu1 %v452_v8, %s1138_s26  ;;  %v411_v7 = vrot.slane %v409_v61, 7  ;;  %v468_v22 = vor.u32 %v467_v19, %v416_v9  ;;  %v340_v28 = vrot.slane %v299_v13, 1  ;;  %v463_v58 = vrot.slane %v405_v56, 1 }
  0x2d   : > { %v407_v59 = vor.u32 %v405_v56, %v404_v55  ;;  %v470_v26 = vor.u32 %v469_v6, %v423_v10  ;;  %v294_v31 = vor.u32 %v292_v32, %v291_v5  ;;  %v296_v10 = vshrl.u32 %v1253_v49, 16 }
  0x2e   : > { %v414_v18 = vor.u32 %v412_v11, %v411_v7  ;;  %v1405_v36 = vsel %vm1180_vm2, %v468_v22, 0  ;;  %v244_v44 = vmax.f32 %v236_v17, 0.0 }
  0x2f   : > { %v453_v3 = vsel %vm1269_vm5, 0, %v407_v59  ;;  %v1413_v9 = vsel %vm1180_vm2, %v470_v26, 0  ;;  %v341_v38 = vor.u32 %v340_v28, %v296_v10 }
  0x30   : > { %573 = vrot.lane.b32.xlu2 %v1242_v41, %s1137_s25  ;;  %511 = vrot.lane.b32.xlu0 %v1225_v29, %s1135_s17  ;;  %v1392_v43 = vsel %vm1269_vm5, 0, %v414_v18  ;;  %v256_v18 = vrot.slane %v1134_v0, 7 }
  0x32   : > { %v320_v19 = vsel %vm1269_vm5, 0, %v256_v18 }
  0x34   : > { %513 = vrot.lane.b32.xlu1 %v1301_v16, %s1135_s17 }
  0x38   : > { %563 = vrot.lane.b32.xlu2 %v1311_v24, %s1138_s26  ;;  %565 = vrot.lane.b32.xlu0 %v1315_v25, %s1138_s26 }
  0x3c   : > { %595 = vrot.lane.b32.xlu1 %v483_v37, %s1139_s27 }
  0x40   : > { %597 = vrot.lane.b32.xlu2 %v1335_v45, %s1139_s27  ;;  %535 = vrot.lane.b32.xlu0 %v357_v46, %s1136_s20  ;;  %v361_v46 = vsel %vm1180_vm2, %v341_v38, 0 }
  0x44   : > { %537 = vrot.lane.b32.xlu1 %v358_v50, %s1136_s20  ;;  %v252_v50 = vpack.c.bf16 %v244_v44, %v244_v44 }
  0x46   : > { %v378_v54 = vunpack.c.l.b16 %v252_v50 }
  0x48   : > { %579 = vrot.lane.b32.xlu2 %v1275_v62, %s1137_s25  ;;  %581 = vrot.lane.b32.xlu0 %v1281_v4, %s1137_s25  ;;  %v1446_v59 = vpack.c.b16 %v378_v54, %v378_v54 }
  0x4a   : > { %v437_v7 = vshrl.u32 %v1446_v59, 16  ;;  %v440_v17 = vshll.u32 %v1446_v59, 16 }
  0x4c   : > { %612 = vrot.lane.b32.xlu1 %v452_v8, %s1140_s28  ;;  %v1378_v8 = vpack.c.bf16 %v243_v63, %v243_v63  ;;  %v324_v63 = vsel %vm1269_vm5, 0, %v287_v21  ;;  %v439_v14 = vrot.slane %v437_v7, 7  ;;  %v465_v21 = vrot.slane %v412_v11, 1 }
  0x4d   : > { %v263_v11 = vrot.slane %v261_v34, 7 }
  0x4e   : > { %v306_v15 = vshll.u32 %v1378_v8, 16  ;;  %v303_v32 = vshrl.u32 %v1378_v8, 16  ;;  %v377_v37 = vunpack.c.l.b16 %v1378_v8 }
  0x50   : > { %614 = vrot.lane.b32.xlu2 %v453_v3, %s1140_s28  ;;  %519 = vrot.lane.b32.xlu0 %v1253_v49, %s1135_s17  ;;  %v342_v30 = vrot.slane %v306_v15, 1  ;;  %v1430_v42 = vpack.c.b16 %v377_v37, %v377_v37 }
  0x52   : > { %v343_v39 = vor.u32 %v342_v30, %v303_v32  ;;  %v433_v53 = vshll.u32 %v1430_v42, 16 }
  0x54   : > { %521 = vrot.lane.b32.xlu1 %v1378_v8, %s1135_s17  ;;  %v362_v47 = vsel %vm1180_vm2, %v343_v39, 0  ;;  %v471_v50 = vrot.slane %v433_v53, 1 }
  0x58   : > { %559 = vrot.lane.b32.xlu2 %v453_v3, %s1138_s26  ;;  %561 = vrot.lane.b32.xlu0 %v1392_v43, %s1138_s26  ;;  %v464_v3 = vor.u32 %v463_v58, %v402_v51  ;;  %v442_v51 = vor.u32 %v440_v17, %v439_v14 }
  0x5a   : > { %v1479_v26 = vsel %vm1269_vm5, 0, %v442_v51 }
  0x5c   : > { %603 = vrot.lane.b32.xlu1 %v1405_v36, %s1139_s27 }
  0x60   : > { %605 = vrot.lane.b32.xlu2 %v1413_v9, %s1139_s27  ;;  %628 = vrot.lane.b32.xlu0 %v1242_v41, %s1141_s29  ;;  %v430_v41 = vshrl.u32 %v1430_v42, 16 }
  0x62   : > { %v432_v52 = vrot.slane %v430_v41, 7 }
  0x64   : > { %630 = vrot.lane.b32.xlu1 %v1341_v48, %s1141_s29  ;;  %v435_v55 = vor.u32 %v433_v53, %v432_v52  ;;  %v493_v53 = vpack.c.b16 %v492_v27, %v492_v27  ;;  %v305_v27 = vrot.slane %v303_v32, 7 }
  0x66   : > { %v457_v1 = vsel %vm1269_vm5, 0, %v435_v55  ;;  %v308_v32 = vor.u32 %v306_v15, %v305_v27 }
  0x68   : > { %543 = vrot.lane.b32.xlu2 %v361_v46, %s1136_s20  ;;  %545 = vrot.lane.b32.xlu0 %v362_v47, %s1136_s20  ;;  %s1065_s20 = sshll.u32 %s1738_s16, 3 }
  0x69   : > { %s208_s23 = scalar_lea.vmem %s1732_s4, %s1065_s20 }
  0x6c   : > { %575 = vrot.lane.b32.xlu1 %v1341_v48, %s1137_s25  ;;  %v325_v48 = vsel %vm1269_vm5, 0, %v294_v31  ;;  %v466_v31 = vor.u32 %v465_v21, %v409_v61  ;;  %v266_v61 = vor.u32 %v264_v35, %v263_v11  ;;  %v472_v35 = vor.u32 %v471_v50, %v430_v41 }
  0x6e   : > { %v1491_v37 = vsel %vm1180_vm2, %v466_v31, 0  ;;  %v321_v34 = vsel %vm1269_vm5, 0, %v266_v61 }
  0x70   : > { %577 = vrot.lane.b32.xlu2 %v1356_v57, %s1137_s25  ;;  %620 = vrot.lane.b32.xlu0 %v1315_v25, %s1140_s28  ;;  %v485_v25 = vsel %vm1180_vm2, %v464_v3, 0  ;;  %v495_v3 = vshrl.u32 %v493_v53, 16 }
  0x72   : > { %v516_v56 = vpop.permute.xlu2 %515  ;;  %v497_v14 = vrot.slane %v495_v3, 7 }
  0x73   : > { %v676_v12 = vsel %vm661_vm6, %v324_v63, %v516_v56  ;;  %v489_v63 = vsel %vm1180_vm2, %v472_v35, 0 }
  0x74   : > { %622 = vrot.lane.b32.xlu1 %v457_v1, %s1140_s28 }
  0x78   : > { %645 = vrot.lane.b32.xlu2 %v1335_v45, %s1142_s30  ;;  %647 = vrot.lane.b32.xlu0 %v485_v25, %s1142_s30 }
  0x7a   : > { %v518_v5 = vpop.permute.xlu2 %517 }
  0x7b   : > { %v679_v6 = vsel %vm661_vm6, %v325_v48, %v518_v5 }
  0x7c   : > { %567 = vrot.lane.b32.xlu1 %v457_v1, %s1138_s26 }
  0x7e   : > { %v508_v22 = vpop.permute.xlu0 %507 }
  0x7f   : > { %v664_v45 = vsel %vm661_vm6, %v320_v19, %v508_v22 }
  0x80   : > { %569 = vrot.lane.b32.xlu2 %v1479_v26, %s1138_s26  ;;  %599 = vrot.lane.b32.xlu0 %v485_v25, %s1139_s27  ;;  %v277_v25 = vrot.slane %v275_v40, 7 }
  0x81   : > { %v532_v28 = vpop.permute.xlu1 %531 }
  0x82   : > { %v688_v30 = vsel %vm686_vm7, %v664_v45, %v532_v28  ;;  %v540_v38 = vpop.permute.xlu2 %539 }
  0x83   : > { %v696_v39 = vsel %vm686_vm7, %v676_v12, %v540_v38 }
  0x84   : > { %601 = vrot.lane.b32.xlu1 %v1491_v37, %s1139_s27 }
  0x88   : > { %636 = vrot.lane.b32.xlu2 %v1281_v4, %s1141_s29  ;;  %638 = vrot.lane.b32.xlu0 %v1430_v42, %s1141_s29 }
  0x8a   : > { %v574_v44 = vpop.permute.xlu2 %573  ;;  %v510_v46 = vpop.permute.xlu0 %509 }
  0x8b   : > { %v667_v47 = vsel %vm661_vm6, %v321_v34, %v510_v46 }
  0x8c   : > { %583 = vrot.lane.b32.xlu1 %v1430_v42, %s1137_s25  ;;  %v270_v42 = vrot.slane %v268_v23, 7 }
  0x8e   : > { %v572_v52 = vpop.permute.xlu1 %571  ;;  %v273_v23 = vor.u32 %v271_v20, %v270_v42  ;;  %v280_v20 = vor.u32 %v278_v33, %v277_v25 }
  0x90   : > { %585 = vrot.lane.b32.xlu2 %v1446_v59, %s1137_s25  ;;  %616 = vrot.lane.b32.xlu0 %v1392_v43, %s1140_s28  ;;  %v473_v43 = vrot.slane %v440_v17, 1  ;;  %v498_v17 = vshll.u32 %v493_v53, 16  ;;  %v322_v29 = vsel %vm1269_vm5, 0, %v273_v23 }
  0x92   : > { %v564_v4 = vpop.permute.xlu2 %563  ;;  %v542_v54 = vpop.permute.xlu0 %541  ;;  %v474_v41 = vor.u32 %v473_v43, %v437_v7  ;;  %v500_v40 = vor.u32 %v498_v17, %v497_v14 }
  0x93   : > { %v713_v55 = vsel %vm703_vm8, %v696_v39, %v564_v4  ;;  %v698_v58 = vsel %vm686_vm7, %v679_v6, %v542_v54  ;;  %v1093_v54 = vld [vmem:[%s1729_s1 + $0x18] sm:$0xff] }
  0x94   : > { %618 = vrot.lane.b32.xlu1 %v1311_v24, %s1140_s28  ;;  %v490_v7 = vsel %vm1180_vm2, %v474_v41, 0  ;;  %v502_v22 = vsel %vm1269_vm5, 0, %v500_v40  ;;  %v1090_v41 = vld [vmem:[%s1729_s1] sm:$0xff] }
  0x96   : > { %v534_v1 = vpop.permute.xlu1 %533 }
  0x97   : > { %v690_v0 = vsel %vm686_vm7, %v667_v47, %v534_v1  ;;  %v1091_v1 = vld [vmem:[%s1729_s1 + $0x8] sm:$0xff] }
  0x98   : > { %653 = vrot.lane.b32.xlu2 %v1413_v9, %s1142_s30  ;;  %655 = vrot.lane.b32.xlu0 %v489_v63, %s1142_s30 }
  0x9a   : > { %v1526_v24 = vpop.permute.xlu2 %597  ;;  %v556_v56 = vpop.permute.xlu0 %555 }
  0x9b   : > { %v705_v12 = vsel %vm703_vm8, %v688_v30, %v556_v56 }
  0x9c   : > { %607 = vrot.lane.b32.xlu1 %v489_v63, %s1139_s27  ;;  %v1535_v9 = vsel %vm720_vm9, %v705_v12, %v572_v52  ;;  %v327_v63 = vsel %vm1269_vm5, 0, %v308_v32 }
  0x9e   : > { %v558_v18 = vpop.permute.xlu1 %557 }
  0x9f   : > { %v707_v48 = vsel %vm703_vm8, %v690_v0, %v558_v18 }
  0xa0   : > { %v1541_v51 = vsel %vm720_vm9, %v707_v48, %v574_v44  ;;  %609 = vrot.lane.b32.xlu2 %v490_v7, %s1139_s27  ;;  %632 = vrot.lane.b32.xlu0 %v1356_v57, %s1141_s29  ;;  %v323_v57 = vsel %vm1269_vm5, 0, %v280_v20 }
  0xa2   : > { %v580_v19 = vpop.permute.xlu2 %579  ;;  %v512_v21 = vpop.permute.xlu0 %511 }
  0xa3   : > { %v1551_v5 = vsel %vm720_vm9, %v713_v55, %v580_v19  ;;  %v670_v6 = vsel %vm661_vm6, %v322_v29, %v512_v21 }
  0xa4   : > { %634 = vrot.lane.b32.xlu1 %v1275_v62, %s1141_s29  ;;  %v503_v62 = vrot.slane %v498_v17, 1 }
  0xa6   : > { %v514_v45 = vpop.permute.xlu1 %513  ;;  %v504_v11 = vor.u32 %v503_v62, %v495_v3 }
  0xa7   : > { %v673_v16 = vsel %vm661_vm6, %v323_v57, %v514_v45 }
  0xa8   : > { %626 = vrot.lane.b32.xlu0 %v502_v22, %s1140_s28  ;;  %624 = vrot.lane.b32.xlu2 %v1479_v26, %s1140_s28 }
  0xaa   : > { %v1564_v33 = vpop.permute.xlu2 %614  ;;  %v566_v31 = vpop.permute.xlu0 %565 }
  0xab   : > { %v715_v28 = vsel %vm703_vm8, %v698_v58, %v566_v31 }
  0xac   : > { %649 = vrot.lane.b32.xlu1 %v1491_v37, %s1142_s30  ;;  %v506_v37 = vsel %vm1180_vm2, %v504_v11, 0 }
  0xae   : > { %v1569_v30 = vpop.permute.xlu1 %595 }
  0xaf   : > { %v739_v20 = vsel %vm737_vm10, %v1535_v9, %v1569_v30 }
  0xb0   : > { %640 = vrot.lane.b32.xlu0 %v1446_v59, %s1141_s29  ;;  %651 = vrot.lane.b32.xlu2 %v1405_v36, %s1142_s30  ;;  %v813_v36 = vld [vmem:[%s1729_s1 + $0x20] sm:$0xf]  ;;  %v298_v59 = vrot.slane %v296_v10, 7 }
  0xb1   : > { %v851_v46 = vunpack.c.l.b16 %v813_v36 }
  0xb2   : > { %v560_v38 = vpop.permute.xlu2 %559  ;;  %v536_v26 = vpop.permute.xlu0 %535  ;;  %v301_v35 = vor.u32 %v299_v13, %v298_v59 }
  0xb3   : > { %v692_v39 = vsel %vm686_vm7, %v670_v6, %v536_v26  ;;  %v856_v2 = vpack.c.b16 %v851_v46, %v851_v46  ;;  %v741_v6 = vsel %vm737_vm10, %v1541_v51, %v1526_v24 }
  0xb4   : > { %642 = vrot.lane.b32.xlu1 %v493_v53, %s1141_s29  ;;  %v1578_v61 = vsel %vm703_vm8, %v692_v39, %v560_v38  ;;  %v326_v55 = vsel %vm1269_vm5, 0, %v301_v35  ;;  %v1092_v53 = vld [vmem:[%s1729_s1 + $0x10] sm:$0xff]  ;;  %v758_v57 = vsel %vm754_vm12, %v741_v6, %v1564_v33 }
  0xb5   : > { %v876_v10 = vsel %vm352_vm0, %v856_v2, 0 }
  0xb6   : > { %v538_v34 = vpop.permute.xlu1 %537  ;;  %881 = vmatpush.bf16.msra.mxu0 %v876_v10  ;;  %1095 = vmatpush.bf16.msra.mxu2 %v876_v10 }
  0xb7   : > { %v694_v44 = vsel %vm686_vm7, %v673_v16, %v538_v34  ;;  %1094 = vmatpush.bf16.msra.mxu1 %v876_v10  ;;  %1096 = vmatpush.bf16.msra.mxu3 %v876_v10 }
  0xb8   : > { %659 = vrot.lane.b32.xlu0 %v506_v37, %s1142_s30  ;;  %657 = vrot.lane.b32.xlu2 %v490_v7, %s1142_s30 }
  0xba   : > { %v1590_v47 = vpop.permute.xlu2 %605  ;;  %v582_v50 = vpop.permute.xlu0 %581  ;;  %882 = vmatpush.bf16.msra.mxu0 %v1093_v54  ;;  %1098 = vmatpush.bf16.msra.mxu2 %v1093_v54 }
  0xbb   : > { %v1593_v52 = vsel %vm720_vm9, %v715_v28, %v582_v50  ;;  %1097 = vmatpush.bf16.msra.mxu1 %v1093_v54  ;;  %1099 = vmatpush.bf16.msra.mxu3 %v1093_v54 }
  0xbc   : > { %v749_v27 = vsel %vm737_vm10, %v1593_v52, %v1590_v47 }
  0xbe   : > { %v613_v4 = vpop.permute.xlu1 %612  ;;  %883 = vmatpush.bf16.msra.mxu0 %v1092_v53  ;;  %1101 = vmatpush.bf16.msra.mxu2 %v1092_v53 }
  0xbf   : > { %1100 = vmatpush.bf16.msra.mxu1 %v1092_v53  ;;  %1102 = vmatpush.bf16.msra.mxu3 %v1092_v53  ;;  %v756_v40 = vsel %vm754_vm12, %v739_v20, %v613_v4 }
  0xc2   : > { %v544_v49 = vpop.permute.xlu2 %543  ;;  %v520_v13 = vpop.permute.xlu0 %519  ;;  %884 = vmatpush.bf16.msra.mxu0 %v1091_v1  ;;  %1104 = vmatpush.bf16.msra.mxu2 %v1091_v1 }
  0xc3   : > { %v682_v58 = vsel %vm661_vm6, %v326_v55, %v520_v13  ;;  %1103 = vmatpush.bf16.msra.mxu1 %v1091_v1  ;;  %1105 = vmatpush.bf16.msra.mxu3 %v1091_v1 }
  0xc4   : > { %v700_v43 = vsel %vm686_vm7, %v682_v58, %v544_v49 }
  0xc6   : > { %v522_v8 = vpop.permute.xlu1 %521  ;;  %885 = vmatpush.bf16.msra.mxu0 %v1090_v41  ;;  %1107 = vmatpush.bf16.msra.mxu2 %v1090_v41 }
  0xc7   : > { %v685_v15 = vsel %vm661_vm6, %v327_v63, %v522_v8  ;;  %1106 = vmatpush.bf16.msra.mxu1 %v1090_v41  ;;  %1108 = vmatpush.bf16.msra.mxu3 %v1090_v41 }
  0xca   : > { %v1618_v0 = vpop.permute.xlu2 %577  ;;  %v562_v42 = vpop.permute.xlu0 %561 }
  0xcb   : > { %v1621_v60 = vsel %vm703_vm8, %v694_v44, %v562_v42 }
  0xcc   : > { %v728_v8 = vsel %vm720_vm9, %v1621_v60, %v1618_v0 }
  0xce   : > { %v604_v3 = vpop.permute.xlu1 %603 }
  0xcf   : > { %v747_v46 = vsel %vm737_vm10, %v1551_v5, %v604_v3 }
  0xd2   : > { %v646_v56 = vpop.permute.xlu2 %645  ;;  %v629_v12 = vpop.permute.xlu0 %628 }
  0xd3   : > { %v773_v19 = vsel %vm771_vm11, %v756_v40, %v629_v12 }
  0xd4   : > { %v790_v22 = vsel %vm788_vm13, %v773_v19, %v646_v56 }
  0xd5   : > { %v822_v62 = vunpack.c.l.b16 %v790_v22 }
  0xd6   : > { %v631_v25 = vpop.permute.xlu1 %630 }
  0xd7   : > { %v775_v45 = vsel %vm771_vm11, %v758_v57, %v631_v25 }
  0xda   : > { %v570_v23 = vpop.permute.xlu2 %569  ;;  %v546_v7 = vpop.permute.xlu0 %545 }
  0xdb   : > { %v702_v14 = vsel %vm686_vm7, %v685_v15, %v546_v7 }
  0xdc   : > { %v719_v17 = vsel %vm703_vm8, %v702_v14, %v570_v23 }
  0xde   : > { %v576_v18 = vpop.permute.xlu1 %575 }
  0xdf   : > { %v726_v56 = vsel %vm720_vm9, %v1578_v61, %v576_v18 }
  0xe2   : > { %v637_v48 = vpop.permute.xlu2 %636  ;;  %v621_v29 = vpop.permute.xlu0 %620 }
  0xe3   : > { %v764_v50 = vsel %vm754_vm12, %v747_v46, %v621_v29 }
  0xe4   : > { %v781_v35 = vsel %vm771_vm11, %v764_v50, %v637_v48 }
  0xe6   : > { %v623_v21 = vpop.permute.xlu1 %622 }
  0xe7   : > { %v766_v10 = vsel %vm754_vm12, %v749_v27, %v623_v21 }
  0xea   : > { %v586_v16 = vpop.permute.xlu2 %585  ;;  %v648_v31 = vpop.permute.xlu0 %647 }
  0xeb   : > { %v736_v9 = vsel %vm720_vm9, %v719_v17, %v586_v16  ;;  %v792_v28 = vsel %vm788_vm13, %v775_v45, %v648_v31 }
  0xec   : > { %v823_v30 = vunpack.c.l.b16 %v792_v28 }
  0xee   : > { %v568_v11 = vpop.permute.xlu1 %567  ;;  %v830_v38 = vpack.c.b16 %v823_v30, %v822_v62 }
  0xef   : > { %v717_v24 = vsel %vm703_vm8, %v700_v43, %v568_v11 }
  0xf0   : > { %1082 = vmatmul.msk.bf16.vlgmr.msra.gmra.mxu0 %vm861_vm14, %v830_v38 }
  0xf2   : > { %v654_v51 = vpop.permute.xlu2 %653  ;;  %v600_v33 = vpop.permute.xlu0 %599 }
  0xf3   : > { %v798_v4 = vsel %vm788_vm13, %v781_v35, %v654_v51  ;;  %v743_v25 = vsel %vm737_vm10, %v726_v56, %v600_v33 }
  0xf4   : > { %v826_v49 = vunpack.c.l.b16 %v798_v4 }
  0xf6   : > { %v602_v26 = vpop.permute.xlu1 %601 }
  0xf7   : > { %v745_v15 = vsel %vm737_vm10, %v728_v8, %v602_v26 }
  0xfa   : > { %v610_v39 = vpop.permute.xlu2 %609  ;;  %v639_v37 = vpop.permute.xlu0 %638 }
  0xfb   : > { %v753_v34 = vsel %vm737_vm10, %v736_v9, %v610_v39  ;;  %v783_v54 = vsel %vm771_vm11, %v766_v10, %v639_v37 }
  0xfe   : > { %v584_v44 = vpop.permute.xlu1 %583 }
  0xff   : > { %v734_v36 = vsel %vm720_vm9, %v717_v24, %v584_v44 }
 0x102   : > { %v617_v59 = vpop.permute.xlu0 %616  ;;  %v625_v13 = vpop.permute.xlu2 %624 }
 0x103   : > { %v760_v23 = vsel %vm754_vm12, %v743_v25, %v617_v59 }
 0x106   : > { %v619_v2 = vpop.permute.xlu1 %618 }
 0x107   : > { %v762_v1 = vsel %vm754_vm12, %v745_v15, %v619_v2 }
 0x10a   : > { %v656_v55 = vpop.permute.xlu0 %655  ;;  %v652_v42 = vpop.permute.xlu2 %651 }
 0x10b   : > { %v800_v32 = vsel %vm788_vm13, %v783_v54, %v656_v55 }
 0x10c   : > { %v827_v5 = vunpack.c.l.b16 %v800_v32 }
 0x10e   : > { %v608_v58 = vpop.permute.xlu1 %607  ;;  %v832_v53 = vpack.c.b16 %v827_v5, %v826_v49 }
 0x10f   : > { %v751_v63 = vsel %vm737_vm10, %v734_v36, %v608_v58 }
 0x110   : > { %v768_v47 = vsel %vm754_vm12, %v751_v63, %v625_v13  ;;  %1084 = vmatmul.msk.bf16.vlgmr.msra.gmra.mxu2 %vm861_vm14, %v832_v53 }
 0x112   : > { %v633_v52 = vpop.permute.xlu0 %632  ;;  %v658_v29 = vpop.permute.xlu2 %657 }
 0x113   : > { %v777_v0 = vsel %vm771_vm11, %v760_v23, %v633_v52 }
 0x116   : > { %v635_v43 = vpop.permute.xlu1 %634 }
 0x117   : > { %v779_v41 = vsel %vm771_vm11, %v762_v1, %v635_v43 }
 0x118   : > { %v796_v7 = vsel %vm788_vm13, %v779_v41, %v652_v42 }
 0x119   : > { %v825_v17 = vunpack.c.l.b16 %v796_v7 }
 0x11a   : > { %v627_v3 = vpop.permute.xlu0 %626 }
 0x11b   : > { %v770_v12 = vsel %vm754_vm12, %v753_v34, %v627_v3 }
 0x11e   : > { %v650_v60 = vpop.permute.xlu1 %649 }
 0x11f   : > { %v794_v14 = vsel %vm788_vm13, %v777_v0, %v650_v60 }
 0x120   : > { %v824_v48 = vunpack.c.l.b16 %v794_v14 }
 0x122   : > { %v641_v20 = vpop.permute.xlu0 %640  ;;  %v831_v40 = vpack.c.b16 %v825_v17, %v824_v48 }
 0x123   : > { %v785_v61 = vsel %vm771_vm11, %v768_v47, %v641_v20 }
 0x124   : > { %v802_v18 = vsel %vm788_vm13, %v785_v61, %v658_v29  ;;  %1083 = vmatmul.msk.bf16.vlgmr.msra.gmra.mxu1 %vm861_vm14, %v831_v40 }
 0x125   : > { %v828_v22 = vunpack.c.l.b16 %v802_v18 }
 0x126   : > { %v643_v19 = vpop.permute.xlu1 %642 }
 0x127   : > { %v787_v21 = vsel %vm771_vm11, %v770_v12, %v643_v19 }
 0x12a   : > { %v660_v6 = vpop.permute.xlu0 %659 }
 0x12b   : > { %v804_v57 = vsel %vm788_vm13, %v787_v21, %v660_v6 }
 0x12c   : > { %v829_v45 = vunpack.c.l.b16 %v804_v57 }
 0x12e   : > { %v833_v16 = vpack.c.b16 %v829_v45, %v828_v22 }
 0x130   : > { %1085 = vmatmul.msk.bf16.vlgmr.msra.gmra.mxu3 %vm861_vm14, %v833_v16 }
 0x16d   : > { %v887_v31 = vpop.f32.mrf.mxu0 }
 0x16e   : > { %907 = vst.msk [vmem:[%s1685_s19] sm:$0xff] %vm661_vm6, %v887_v31  ;;  %v936_v24 = vmul.f32 %v887_v31, %v887_v31  ;;  %v915_v26 = vsel %vm661_vm6, %v887_v31, 0.0 }
 0x170   : > { %v944_v36 = vsel %vm661_vm6, %v936_v24, 0.0 }
 0x175   : > { %v889_v9 = vpop.f32.mrf.mxu0 }
 0x176   : > { %908 = vst.msk [vmem:[%s1685_s19 + $0x8] sm:$0xff] %vm661_vm6, %v889_v9  ;;  %v937_v11 = vmul.f32 %v889_v9, %v889_v9  ;;  %v916_v51 = vsel %vm661_vm6, %v889_v9, 0.0 }
 0x177   : > { %v917_v44 = vadd.f32 %v916_v51, %v915_v26 }
 0x178   : > { %v945_v39 = vsel %vm661_vm6, %v937_v11, 0.0 }
 0x179   : > { %v946_v50 = vadd.f32 %v945_v39, %v944_v36 }
 0x193   : > { %v897_v28 = vpop.f32.mrf.mxu2 }
 0x194   : > { %911 = vst.msk [vmem:[%s1685_s19 + $0x20] sm:$0xff] %vm661_vm6, %v897_v28  ;;  %v940_v4 = vmul.f32 %v897_v28, %v897_v28  ;;  %v922_v32 = vsel %vm661_vm6, %v897_v28, 0.0 }
 0x196   : > { %v951_v5 = vsel %vm661_vm6, %v940_v4, 0.0 }
 0x19b   : > { %v899_v62 = vpop.f32.mrf.mxu2 }
 0x19c   : > { %912 = vst.msk [vmem:[%s1685_s19 + $0x28] sm:$0xff] %vm661_vm6, %v899_v62  ;;  %v941_v13 = vmul.f32 %v899_v62, %v899_v62  ;;  %v924_v63 = vsel %vm661_vm6, %v899_v62, 0.0 }
 0x19e   : > { %v953_v43 = vsel %vm661_vm6, %v941_v13, 0.0 }
 0x1a1   : > { %v892_v30 = vpop.f32.mrf.mxu1 }
 0x1a2   : > { %909 = vst.msk [vmem:[%s1685_s19 + $0x10] sm:$0xff] %vm661_vm6, %v892_v30  ;;  %v938_v33 = vmul.f32 %v892_v30, %v892_v30  ;;  %v918_v37 = vsel %vm661_vm6, %v892_v30, 0.0 }
 0x1a3   : > { %v919_v2 = vadd.f32 %v918_v37, %v917_v44 }
 0x1a4   : > { %v947_v59 = vsel %vm661_vm6, %v938_v33, 0.0 }
 0x1a5   : > { %v948_v35 = vadd.f32 %v947_v59, %v946_v50 }
 0x1a9   : > { %v894_v38 = vpop.f32.mrf.mxu1 }
 0x1aa   : > { %910 = vst.msk [vmem:[%s1685_s19 + $0x18] sm:$0xff] %vm661_vm6, %v894_v38  ;;  %v939_v34 = vmul.f32 %v894_v38, %v894_v38  ;;  %v920_v46 = vsel %vm661_vm6, %v894_v38, 0.0 }
 0x1ab   : > { %v921_v10 = vadd.f32 %v920_v46, %v919_v2 }
 0x1ac   : > { %v949_v27 = vsel %vm661_vm6, %v939_v34, 0.0 }
 0x1ad   : > { %v950_v54 = vadd.f32 %v949_v27, %v948_v35  ;;  %v923_v49 = vadd.f32 %v922_v32, %v921_v10 }
 0x1af   : > { %v952_v53 = vadd.f32 %v951_v5, %v950_v54  ;;  %v925_v52 = vadd.f32 %v924_v63, %v923_v49 }
 0x1b1   : > { %v954_v1 = vadd.f32 %v953_v43, %v952_v53 }
 0x1b3   : > { %v902_v55 = vpop.f32.mrf.mxu3 }
 0x1b4   : > { %913 = vst.msk [vmem:[%s1685_s19 + $0x30] sm:$0xff] %vm661_vm6, %v902_v55  ;;  %v942_v58 = vmul.f32 %v902_v55, %v902_v55  ;;  %v926_v47 = vsel %vm661_vm6, %v902_v55, 0.0 }
 0x1b5   : > { %v927_v15 = vadd.f32 %v926_v47, %v925_v52 }
 0x1b6   : > { %v955_v8 = vsel %vm661_vm6, %v942_v58, 0.0 }
 0x1b7   : > { %v956_v56 = vadd.f32 %v955_v8, %v954_v1 }
 0x1bb   : > { %v904_v42 = vpop.f32.mrf.mxu3 }
 0x1bc   : > { %914 = vst.msk [vmem:[%s1685_s19 + $0x38] sm:$0xff] %vm661_vm6, %v904_v42  ;;  %v928_v41 = vsel %vm661_vm6, %v904_v42, 0.0  ;;  %v943_v3 = vmul.f32 %v904_v42, %v904_v42 }
 0x1bd   : > { %v929_v12 = vadd.f32 %v928_v41, %v927_v15 }
 0x1be   : > { %v957_v25 = vsel %vm661_vm6, %v943_v3, 0.0 }
 0x1bf   : > { %v930_v23 = vrot.slane %v929_v12, 4  ;;  %v958_v7 = vadd.f32 %v957_v25, %v956_v56 }
 0x1c1   : > { %v931_v0 = vadd.f32 %v930_v23, %v929_v12  ;;  %v959_v60 = vrot.slane %v958_v7, 4 }
 0x1c3   : > { %v932_v14 = vrot.slane %v931_v0, 2  ;;  %v960_v17 = vadd.f32 %v959_v60, %v958_v7 }
 0x1c5   : > { %v933_v48 = vadd.f32 %v932_v14, %v931_v0  ;;  %v961_v29 = vrot.slane %v960_v17, 2 }
 0x1c7   : > { %v934_v20 = vrot.slane %v933_v48, 1  ;;  %v962_v40 = vadd.f32 %v961_v29, %v960_v17 }
 0x1c9   : > { %v963_v61 = vrot.slane %v962_v40, 1  ;;  %v935_v18 = vadd.f32 %v934_v20, %v933_v48 }
 0x1cb   : > { %v964_v19 = vadd.f32 %v963_v61, %v962_v40 }
 0x1cd   : > { %v966_v21 = vsel %vm317_vm3, %v935_v18, %v964_v19 }
 0x1ce   : > { %v968_v6 = vsel %vm967_vm15, %v966_v21, 0.0 }
 0x1cf   : > { %969 = vst.msk [vmem:[%s208_s23] sm:$0xff] %vm661_vm6, %v968_v6 }
 0x1d0 PF: > { %s15_s15 = sadd.s32 1, %s1132_s15  }
 0x1d1   : > { %p12_p4 = scmp.ge.s32.totalorder %s15_s15, 4  }
 0x1d3   :  { %14 = sbr.rel (!%p12_p4) target bundleno = 1 (0x1), region = 74 }

</bundles_post_ra>
